<compile_context>
chip_gen: v7x
topology: tpu7x:2x2x1
jax: 0.10.0
libtpu: 0.0.40
codegen_flags: <defaults>
</compile_context>

<pallas_src>
import functools

import jax
import jax.numpy as jnp
from jax import lax
from jax.experimental import pallas as pl
from jax.experimental.pallas import tpu as pltpu

EPS = 1e-5
MXU_DTYPE = jnp.bfloat16          # matmul-input / streamed-intermediate dtype


def _vmem_limit_bytes():
    """Per-generation scoped-VMEM budget: ~3/4 of physical, clamped to [32, 96] MiB
    (v5e/v6e: 128 MiB physical -> 96 MiB; v7x: 64 MiB physical -> 48 MiB)."""
    cap = 64 << 20
    try:
        info = pltpu.get_tpu_info()
        cap = int(getattr(info, "vmem_capacity_bytes", cap) or cap)
    except Exception:
        pass
    return int(min(96 << 20, max(32 << 20, (cap * 3) // 4)))


def _pick_row_tile(H, W, row_bytes, target_bytes):
    """Largest TH dividing H with TH % 8 == 0 and (TH*W) % 128 == 0 under the VMEM
    target; falls back to the whole image (always legal for the BlockSpecs used)."""
    max_rows = max(1, target_bytes // max(row_bytes, 1))
    if H <= max_rows:
        return H
    best = None
    for t in range(8, min(H, max_rows) + 1, 8):
        if H % t == 0 and (t * W) % 128 == 0:
            best = t
    return best if best is not None else H


def _pick_spatial_tile(HW, per_elem_bytes, target_bytes):
    """Largest TS dividing H*W with TS % 128 == 0 under the VMEM target."""
    max_ts = max(128, target_bytes // max(per_elem_bytes, 1))
    if HW <= max_ts:
        return HW
    best = None
    t = 128
    while t <= min(HW, max_ts):
        if HW % t == 0:
            best = t
        t += 128
    return best if best is not None else HW


# -----------------------------------------------------------------------------
# Phase 1: conv3x3 (one im2col matmul per tile) + BN-stat accumulation.
# grid = (N, H // TH); row-tile axis is the reduction ("arbitrary") axis.
# -----------------------------------------------------------------------------
def conv_stats_kernel(xph_ref, wk_ref, z_ref, s1_ref, s2_ref, patch_ref, *, TH, W, Cin):
    # xph_ref : (1, 1, TH+2, W+2, Cin) bf16  haloed, zero-padded input row tile
    # wk_ref  : (Cout, 9*Cin)          bf16  conv weight, col = (kh*3+kw)*Cin + ci
    # z_ref   : (1, Cout, TH*W)        bf16  lane-dense channel-major conv output
    # s1/s2   : (1, Cout, 1)           f32   per-image channel sum / sum-of-squares
    # patch   : (TH, W, 9*Cin)         bf16  im2col staging scratch (VMEM)
    i = pl.program_id(1)

    # Build the im2col patch (9 static window copies; starts are compile-time).
    for kh in range(3):
        for kw in range(3):
            k = kh * 3 + kw
            patch_ref[:, :, k * Cin:(k + 1) * Cin] = (
                xph_ref[0, 0, pl.ds(kh, TH), pl.ds(kw, W), :])

    # Single MXU matmul per tile in A @ B^T orientation so the result comes out
    # channel-major (Cout, TH*W): lane-dense z stores, and the final output is
    # already NCHW-ordered (no trailing transpose pass over HBM).
    acc = lax.dot_general(
        wk_ref[...], patch_ref[...].reshape(TH * W, 9 * Cin),
        dimension_numbers=(((1,), (1,)), ((), ())),
        preferred_element_type=jnp.float32)                     # (Cout, TH*W) f32

    z_ref[...] = acc.astype(z_ref.dtype)[None]

    @pl.when(i == 0)
    def _():
        s1_ref[...] = jnp.zeros_like(s1_ref)
        s2_ref[...] = jnp.zeros_like(s2_ref)

    # Fused single-pass BN statistics from the f32 accumulator.
    s1_ref[...] += jnp.sum(acc, axis=1, keepdims=True)[None]
    s2_ref[...] += jnp.sum(acc * acc, axis=1, keepdims=True)[None]


# -----------------------------------------------------------------------------
# Phase 2: GAP of relu(bn(z)).  grid = (N, HW // TS); pooled accumulates over tiles.
# -----------------------------------------------------------------------------
def pool_kernel(z_ref, scale_ref, shift_ref, pooled_ref):
    # z_ref      : (1, Cout, TS) bf16     scale/shift: (1, Cout, 1) f32
    # pooled_ref : (1, Cout, 1)  f32      per-image per-channel spatial sum
    s = pl.program_id(1)
    y = jnp.maximum(
        z_ref[...].astype(jnp.float32) * scale_ref[...] + shift_ref[...], 0.0)

    @pl.when(s == 0)
    def _():
        pooled_ref[...] = jnp.zeros_like(pooled_ref)

    pooled_ref[...] += jnp.sum(y, axis=2, keepdims=True)


# -----------------------------------------------------------------------------
# Phase 3: normalize + ReLU + channel gate, lane-dense channel-major output.
# -----------------------------------------------------------------------------
def apply_kernel(z_ref, scale_ref, shift_ref, gate_ref, o_ref):
    y = jnp.maximum(
        z_ref[...].astype(jnp.float32) * scale_ref[...] + shift_ref[...], 0.0)
    o_ref[...] = (y * gate_ref[...]).astype(o_ref.dtype)


# -----------------------------------------------------------------------------
# Wrapper (PyTorch NCHW contract at the boundary)
# -----------------------------------------------------------------------------
def fac_forward(x_nchw, w_conv, g1, b1, w_att, g2, b2):
    """x_nchw: (N, Cin, H, W); w_conv: (Cout, Cin, 3, 3); w_att: (Cout, Cout, 1, 1);
       g/b: (Cout,).  Returns (N, Cout, H, W) float32."""
    N, Cin, H, W = x_nchw.shape
    Cout = w_conv.shape[0]
    HW = H * W

    vmem_limit = _vmem_limit_bytes()
    target = vmem_limit // 8      # per-block budget, leaves room for double-buffering

    # ---- tile selection ----
    row_bytes = 2 * ((W + 2) * Cin + 9 * W * Cin + W * Cout) + 4 * W * Cout
    TH = _pick_row_tile(H, W, row_bytes, target)
    HT = H // TH
    TS = _pick_spatial_tile(HW, Cout * (2 + 4), target)   # bf16 z in + f32 out
    ST = HW // TS

    # ---- boundary layout prep (cheap, O(N*H*W*Cin)) ----
    x_nhwc = jnp.transpose(x_nchw, (0, 2, 3, 1)).astype(MXU_DTYPE)
    xp = jnp.pad(x_nhwc, ((0, 0), (1, 1), (1, 1), (0, 0)))           # (N, H+2, W+2, Cin)
    # Haloed row tiles: tile i holds padded rows [i*TH, i*TH + TH + 2).
    hidx = jnp.arange(HT)[:, None] * TH + jnp.arange(TH + 2)[None, :]
    xph = xp[:, hidx]                                                # (N, HT, TH+2, W+2, Cin)

    # conv weight as (Cout, 9*Cin), col = (kh*3+kw)*Cin + ci, bf16 MXU operand
    wk = jnp.transpose(w_conv, (0, 2, 3, 1)).reshape(Cout, 9 * Cin).astype(MXU_DTYPE)
    # 1x1 attention-conv weight as (in, out)
    w_att_k = jnp.transpose(w_att[:, :, 0, 0], (1, 0)).astype(jnp.float32)

    cp_reduce = pltpu.CompilerParams(
        dimension_semantics=("parallel", "arbitrary"), vmem_limit_bytes=vmem_limit)
    cp_parallel = pltpu.CompilerParams(
        dimension_semantics=("parallel", "parallel"), vmem_limit_bytes=vmem_limit)

    # -------- phase 1: conv + BN-stat accumulation --------
    # TODO(synk): for N==1 on v7x, split the row-tile axis across both TensorCores
    # with per-core partial s1/s2 and sum them in the wrapper.
    kern1 = functools.partial(conv_stats_kernel, TH=TH, W=W, Cin=Cin)
    z, s1, s2 = pl.pallas_call(
        kern1,
        grid=(N, HT),
        in_specs=[
            pl.BlockSpec((1, 1, TH + 2, W + 2, Cin), lambda n, i: (n, i, 0, 0, 0)),
            pl.BlockSpec((Cout, 9 * Cin), lambda n, i: (0, 0)),
        ],
        out_specs=(
            pl.BlockSpec((1, Cout, TH * W), lambda n, i: (n, 0, i)),
            pl.BlockSpec((1, Cout, 1), lambda n, i: (n, 0, 0)),
            pl.BlockSpec((1, Cout, 1), lambda n, i: (n, 0, 0)),
        ),
        out_shape=(
            jax.ShapeDtypeStruct((N, Cout, HW), MXU_DTYPE),
            jax.ShapeDtypeStruct((N, Cout, 1), jnp.float32),
            jax.ShapeDtypeStruct((N, Cout, 1), jnp.float32),
        ),
        scratch_shapes=[pltpu.VMEM((TH, W, 9 * Cin), MXU_DTYPE)],
        compiler_params=cp_reduce,
    )(xph, wk)

    # -------- tiny glue: finalize BN1 stats (O(Cout), left to XLA) --------
    # TODO(synk): E[x^2]-E[x]^2 in f32 can cancel for very large batches/activations;
    # switch to a shifted / two-pass variance if inputs are far from zero-mean.
    n_el = N * HW
    g1f = g1.astype(jnp.float32)
    mean1 = jnp.sum(s1, axis=0)[:, 0] / n_el                         # (Cout,)
    var1 = jnp.maximum(jnp.sum(s2, axis=0)[:, 0] / n_el - mean1 * mean1, 0.0)
    inv1 = lax.rsqrt(var1 + EPS)
    scale = (g1f * inv1).reshape(1, Cout, 1)
    shift = (b1.astype(jnp.float32) - mean1 * g1f * inv1).reshape(1, Cout, 1)

    # -------- phase 2: GAP of relu(bn(z)) --------
    pooled = pl.pallas_call(
        pool_kernel,
        grid=(N, ST),
        in_specs=[
            pl.BlockSpec((1, Cout, TS), lambda n, s: (n, 0, s)),
            pl.BlockSpec((1, Cout, 1), lambda n, s: (0, 0, 0)),
            pl.BlockSpec((1, Cout, 1), lambda n, s: (0, 0, 0)),
        ],
        out_specs=pl.BlockSpec((1, Cout, 1), lambda n, s: (n, 0, 0)),
        out_shape=jax.ShapeDtypeStruct((N, Cout, 1), jnp.float32),
        compiler_params=cp_reduce,
    )(z, scale, shift)

    # -------- tiny glue: 1x1 conv + bn_atten + sigmoid (O(N*Cout)) --------
    feat = pooled[:, :, 0] / HW                                      # (N, Cout) GAP
    att = feat @ w_att_k
    m2 = jnp.mean(att, axis=0, keepdims=True)
    v2 = jnp.mean((att - m2) ** 2, axis=0, keepdims=True)
    att = (att - m2) * lax.rsqrt(v2 + EPS) * g2.reshape(1, Cout) + b2.reshape(1, Cout)
    gate = jax.nn.sigmoid(att).reshape(N, Cout, 1).astype(jnp.float32)

    # -------- phase 3: normalize + ReLU + gate, channel-major (== NCHW) output ------
    out = pl.pallas_call(
        apply_kernel,
        grid=(N, ST),
        in_specs=[
            pl.BlockSpec((1, Cout, TS), lambda n, s: (n, 0, s)),
            pl.BlockSpec((1, Cout, 1), lambda n, s: (0, 0, 0)),
            pl.BlockSpec((1, Cout, 1), lambda n, s: (0, 0, 0)),
            pl.BlockSpec((1, Cout, 1), lambda n, s: (n, 0, 0)),
        ],
        out_specs=pl.BlockSpec((1, Cout, TS), lambda n, s: (n, 0, s)),
        out_shape=jax.ShapeDtypeStruct((N, Cout, HW), jnp.float32),
        compiler_params=cp_parallel,
    )(z, scale, shift, gate)

    # (N, Cout, H*W) is already NCHW-ordered; this reshape is free (no data movement).
    return out.reshape(N, Cout, H, W)


# ---------------- pure-JAX reference (correctness check) ----------------
def fac_reference(x, w_conv, g1, b1, w_att, g2, b2):
    dn = ("NCHW", "OIHW", "NCHW")
    y = lax.conv_general_dilated(x, w_conv, (1, 1), "SAME", dimension_numbers=dn)
    m = y.mean(axis=(0, 2, 3), keepdims=True)
    v = ((y - m) ** 2).mean(axis=(0, 2, 3), keepdims=True)
    y = (y - m) / jnp.sqrt(v + EPS) * g1.reshape(1, -1, 1, 1) + b1.reshape(1, -1, 1, 1)
    y = jnp.maximum(y, 0.0)
    feat = y.mean(axis=(2, 3), keepdims=True)
    feat = lax.conv_general_dilated(feat, w_att, (1, 1), "VALID", dimension_numbers=dn)
    m2 = feat.mean(axis=(0, 2, 3), keepdims=True)
    v2 = ((feat - m2) ** 2).mean(axis=(0, 2, 3), keepdims=True)
    feat = (feat - m2) / jnp.sqrt(v2 + EPS) * g2.reshape(1, -1, 1, 1) + b2.reshape(1, -1, 1, 1)
    feat = jax.nn.sigmoid(feat)
    return y * feat


if __name__ == "__main__":
    N, Cin, Cout, H, W = 2, 4, 8, 16, 16

    key = jax.random.PRNGKey(0)
    kx, kw1, kw2, kg1, kb1, kg2, kb2 = jax.random.split(key, 7)

    x = jax.random.normal(kx, (N, Cin, H, W), jnp.float32)
    w_conv = jax.random.normal(kw1, (Cout, Cin, 3, 3), jnp.float32) * 0.1
    w_att = jax.random.normal(kw2, (Cout, Cout, 1, 1), jnp.float32) * 0.1
    g1 = 1.0 + 0.1 * jax.random.normal(kg1, (Cout,), jnp.float32)
    b1 = 0.1 * jax.random.normal(kb1, (Cout,), jnp.float32)
    g2 = 1.0 + 0.1 * jax.random.normal(kg2, (Cout,), jnp.float32)
    b2 = 0.1 * jax.random.normal(kb2, (Cout,), jnp.float32)

    out = fac_forward(x, w_conv, g1, b1, w_att, g2, b2)
    out = jax.block_until_ready(out)

    ref = fac_reference(x, w_conv, g1, b1, w_att, g2, b2)
    assert out.shape == (N, Cout, H, W)
    # bf16 matmul inputs + bf16 z intermediate (f32 accumulation / statistics).
    assert jnp.allclose(out, ref, atol=3e-2, rtol=3e-2), "mismatch vs reference"

    print("KERNEL_OK")
</pallas_src>

<mosaic_0001>
module attributes {stable_mosaic.version = 11 : i64} {
  func.func @conv_stats_kernel(%arg0: i32, %arg1: i32, %arg2: memref<1x1x18x18x4xbf16, #tpu.memory_space<vmem>>, %arg3: memref<8x36xbf16, #tpu.memory_space<vmem>>, %arg4: memref<1x8x256xbf16, #tpu.memory_space<vmem>>, %arg5: memref<1x8x1xf32, #tpu.memory_space<vmem>>, %arg6: memref<1x8x1xf32, #tpu.memory_space<vmem>>, %arg7: memref<16x16x36xbf16, #tpu.memory_space<vmem>>) attributes {dimension_semantics = [#tpu.dimension_semantics<parallel>, #tpu.dimension_semantics<arbitrary>], iteration_bounds = array<i64: 2, 1>, scalar_prefetch = 0 : i64, scratch_operands = 1 : i64, tpu.core_type = #tpu.core_type<tc>, window_params = [{transform_indices = @transform_0, window_bounds = array<i64: 1, 1, 18, 18, 4>}, {pipeline_mode = #tpu.pipeline_mode<synchronous>, transform_indices = @transform_1, window_bounds = array<i64: 8, 36>}, {transform_indices = @transform_2, window_bounds = array<i64: 1, 8, 256>}, {transform_indices = @transform_3, window_bounds = array<i64: 1, 8, 1>}, {transform_indices = @transform_4, window_bounds = array<i64: 1, 8, 1>}]} {
    %c0 = arith.constant 0 : index
    %c0_0 = arith.constant 0 : index
    %c0_1 = arith.constant 0 : index
    %c0_2 = arith.constant 0 : index
    %c0_3 = arith.constant 0 : index
    %0 = vector.load %arg2[%c0, %c0_0, %c0_1, %c0_2, %c0_3] : memref<1x1x18x18x4xbf16, #tpu.memory_space<vmem>>, vector<1x1x16x16x4xbf16>
    %1 = vector.shape_cast %0 : vector<1x1x16x16x4xbf16> to vector<16x16x4xbf16>
    %c0_4 = arith.constant 0 : index
    %c0_5 = arith.constant 0 : index
    %c0_6 = arith.constant 0 : index
    %2 = vector.load %arg7[%c0_4, %c0_5, %c0_6] : memref<16x16x36xbf16, #tpu.memory_space<vmem>>, vector<16x16x4xbf16>
    tpu.vector_store %arg7[%c0_4, %c0_5, %c0_6], %1 {strides = array<i32>} : memref<16x16x36xbf16, #tpu.memory_space<vmem>>, vector<16x16x4xbf16>,
    %c0_7 = arith.constant 0 : index
    %c0_8 = arith.constant 0 : index
    %c0_9 = arith.constant 0 : index
    %c1 = arith.constant 1 : index
    %c0_10 = arith.constant 0 : index
    %3 = vector.load %arg2[%c0_7, %c0_8, %c0_9, %c1, %c0_10] : memref<1x1x18x18x4xbf16, #tpu.memory_space<vmem>>, vector<1x1x16x16x4xbf16>
    %4 = vector.shape_cast %3 : vector<1x1x16x16x4xbf16> to vector<16x16x4xbf16>
    %c0_11 = arith.constant 0 : index
    %c0_12 = arith.constant 0 : index
    %c4 = arith.constant 4 : index
    %5 = vector.load %arg7[%c0_11, %c0_12, %c4] : memref<16x16x36xbf16, #tpu.memory_space<vmem>>, vector<16x16x4xbf16>
    tpu.vector_store %arg7[%c0_11, %c0_12, %c4], %4 {strides = array<i32>} : memref<16x16x36xbf16, #tpu.memory_space<vmem>>, vector<16x16x4xbf16>,
    %c0_13 = arith.constant 0 : index
    %c0_14 = arith.constant 0 : index
    %c0_15 = arith.constant 0 : index
    %c2 = arith.constant 2 : index
    %c0_16 = arith.constant 0 : index
    %6 = vector.load %arg2[%c0_13, %c0_14, %c0_15, %c2, %c0_16] : memref<1x1x18x18x4xbf16, #tpu.memory_space<vmem>>, vector<1x1x16x16x4xbf16>
    %7 = vector.shape_cast %6 : vector<1x1x16x16x4xbf16> to vector<16x16x4xbf16>
    %c0_17 = arith.constant 0 : index
    %c0_18 = arith.constant 0 : index
    %c8 = arith.constant 8 : index
    %8 = vector.load %arg7[%c0_17, %c0_18, %c8] : memref<16x16x36xbf16, #tpu.memory_space<vmem>>, vector<16x16x4xbf16>
    tpu.vector_store %arg7[%c0_17, %c0_18, %c8], %7 {strides = array<i32>} : memref<16x16x36xbf16, #tpu.memory_space<vmem>>, vector<16x16x4xbf16>,
    %c0_19 = arith.constant 0 : index
    %c0_20 = arith.constant 0 : index
    %c1_21 = arith.constant 1 : index
    %c0_22 = arith.constant 0 : index
    %c0_23 = arith.constant 0 : index
    %9 = vector.load %arg2[%c0_19, %c0_20, %c1_21, %c0_22, %c0_23] : memref<1x1x18x18x4xbf16, #tpu.memory_space<vmem>>, vector<1x1x16x16x4xbf16>
    %10 = vector.shape_cast %9 : vector<1x1x16x16x4xbf16> to vector<16x16x4xbf16>
    %c0_24 = arith.constant 0 : index
    %c0_25 = arith.constant 0 : index
    %c12 = arith.constant 12 : index
    %11 = vector.load %arg7[%c0_24, %c0_25, %c12] : memref<16x16x36xbf16, #tpu.memory_space<vmem>>, vector<16x16x4xbf16>
    tpu.vector_store %arg7[%c0_24, %c0_25, %c12], %10 {strides = array<i32>} : memref<16x16x36xbf16, #tpu.memory_space<vmem>>, vector<16x16x4xbf16>,
    %c0_26 = arith.constant 0 : index
    %c0_27 = arith.constant 0 : index
    %c1_28 = arith.constant 1 : index
    %c1_29 = arith.constant 1 : index
    %c0_30 = arith.constant 0 : index
    %12 = vector.load %arg2[%c0_26, %c0_27, %c1_28, %c1_29, %c0_30] : memref<1x1x18x18x4xbf16, #tpu.memory_space<vmem>>, vector<1x1x16x16x4xbf16>
    %13 = vector.shape_cast %12 : vector<1x1x16x16x4xbf16> to vector<16x16x4xbf16>
    %c0_31 = arith.constant 0 : index
    %c0_32 = arith.constant 0 : index
    %c16 = arith.constant 16 : index
    %14 = vector.load %arg7[%c0_31, %c0_32, %c16] : memref<16x16x36xbf16, #tpu.memory_space<vmem>>, vector<16x16x4xbf16>
    tpu.vector_store %arg7[%c0_31, %c0_32, %c16], %13 {strides = array<i32>} : memref<16x16x36xbf16, #tpu.memory_space<vmem>>, vector<16x16x4xbf16>,
    %c0_33 = arith.constant 0 : index
    %c0_34 = arith.constant 0 : index
    %c1_35 = arith.constant 1 : index
    %c2_36 = arith.constant 2 : index
    %c0_37 = arith.constant 0 : index
    %15 = vector.load %arg2[%c0_33, %c0_34, %c1_35, %c2_36, %c0_37] : memref<1x1x18x18x4xbf16, #tpu.memory_space<vmem>>, vector<1x1x16x16x4xbf16>
    %16 = vector.shape_cast %15 : vector<1x1x16x16x4xbf16> to vector<16x16x4xbf16>
    %c0_38 = arith.constant 0 : index
    %c0_39 = arith.constant 0 : index
    %c20 = arith.constant 20 : index
    %17 = vector.load %arg7[%c0_38, %c0_39, %c20] : memref<16x16x36xbf16, #tpu.memory_space<vmem>>, vector<16x16x4xbf16>
    tpu.vector_store %arg7[%c0_38, %c0_39, %c20], %16 {strides = array<i32>} : memref<16x16x36xbf16, #tpu.memory_space<vmem>>, vector<16x16x4xbf16>,
    %c0_40 = arith.constant 0 : index
    %c0_41 = arith.constant 0 : index
    %c2_42 = arith.constant 2 : index
    %c0_43 = arith.constant 0 : index
    %c0_44 = arith.constant 0 : index
    %18 = vector.load %arg2[%c0_40, %c0_41, %c2_42, %c0_43, %c0_44] : memref<1x1x18x18x4xbf16, #tpu.memory_space<vmem>>, vector<1x1x16x16x4xbf16>
    %19 = vector.shape_cast %18 : vector<1x1x16x16x4xbf16> to vector<16x16x4xbf16>
    %c0_45 = arith.constant 0 : index
    %c0_46 = arith.constant 0 : index
    %c24 = arith.constant 24 : index
    %20 = vector.load %arg7[%c0_45, %c0_46, %c24] : memref<16x16x36xbf16, #tpu.memory_space<vmem>>, vector<16x16x4xbf16>
    tpu.vector_store %arg7[%c0_45, %c0_46, %c24], %19 {strides = array<i32>} : memref<16x16x36xbf16, #tpu.memory_space<vmem>>, vector<16x16x4xbf16>,
    %c0_47 = arith.constant 0 : index
    %c0_48 = arith.constant 0 : index
    %c2_49 = arith.constant 2 : index
    %c1_50 = arith.constant 1 : index
    %c0_51 = arith.constant 0 : index
    %21 = vector.load %arg2[%c0_47, %c0_48, %c2_49, %c1_50, %c0_51] : memref<1x1x18x18x4xbf16, #tpu.memory_space<vmem>>, vector<1x1x16x16x4xbf16>
    %22 = vector.shape_cast %21 : vector<1x1x16x16x4xbf16> to vector<16x16x4xbf16>
    %c0_52 = arith.constant 0 : index
    %c0_53 = arith.constant 0 : index
    %c28 = arith.constant 28 : index
    %23 = vector.load %arg7[%c0_52, %c0_53, %c28] : memref<16x16x36xbf16, #tpu.memory_space<vmem>>, vector<16x16x4xbf16>
    tpu.vector_store %arg7[%c0_52, %c0_53, %c28], %22 {strides = array<i32>} : memref<16x16x36xbf16, #tpu.memory_space<vmem>>, vector<16x16x4xbf16>,
    %c0_54 = arith.constant 0 : index
    %c0_55 = arith.constant 0 : index
    %c2_56 = arith.constant 2 : index
    %c2_57 = arith.constant 2 : index
    %c0_58 = arith.constant 0 : index
    %24 = vector.load %arg2[%c0_54, %c0_55, %c2_56, %c2_57, %c0_58] : memref<1x1x18x18x4xbf16, #tpu.memory_space<vmem>>, vector<1x1x16x16x4xbf16>
    %25 = vector.shape_cast %24 : vector<1x1x16x16x4xbf16> to vector<16x16x4xbf16>
    %c0_59 = arith.constant 0 : index
    %c0_60 = arith.constant 0 : index
    %c32 = arith.constant 32 : index
    %26 = vector.load %arg7[%c0_59, %c0_60, %c32] : memref<16x16x36xbf16, #tpu.memory_space<vmem>>, vector<16x16x4xbf16>
    tpu.vector_store %arg7[%c0_59, %c0_60, %c32], %25 {strides = array<i32>} : memref<16x16x36xbf16, #tpu.memory_space<vmem>>, vector<16x16x4xbf16>,
    %c0_61 = arith.constant 0 : index
    %c0_62 = arith.constant 0 : index
    %27 = vector.load %arg3[%c0_61, %c0_62] : memref<8x36xbf16, #tpu.memory_space<vmem>>, vector<8x36xbf16>
    %c0_63 = arith.constant 0 : index
    %c0_64 = arith.constant 0 : index
    %c0_65 = arith.constant 0 : index
    %28 = vector.load %arg7[%c0_63, %c0_64, %c0_65] : memref<16x16x36xbf16, #tpu.memory_space<vmem>>, vector<16x16x36xbf16>
    %29 = vector.shape_cast %28 : vector<16x16x36xbf16> to vector<256x36xbf16>
    %cst = arith.constant dense<0.000000e+00> : vector<8x256xf32>
    %30 = tpu.matmul %27, %29, %cst {dimension_numbers = #tpu.dot_dimension_numbers<[1], [1], [0], [0], [0, 0, 1, 0], [], []>} : vector<8x36xbf16>, vector<256x36xbf16>, vector<8x256xf32> -> vector<8x256xf32>
    %31 = arith.truncf %30 : vector<8x256xf32> to vector<8x256xbf16>
    %32 = vector.shape_cast %31 : vector<8x256xbf16> to vector<1x8x256xbf16>
    %c0_66 = arith.constant 0 : index
    %c0_67 = arith.constant 0 : index
    %c0_68 = arith.constant 0 : index
    %33 = vector.load %arg4[%c0_66, %c0_67, %c0_68] : memref<1x8x256xbf16, #tpu.memory_space<vmem>>, vector<1x8x256xbf16>
    tpu.vector_store %arg4[%c0_66, %c0_67, %c0_68], %32 {strides = array<i32>} : memref<1x8x256xbf16, #tpu.memory_space<vmem>>, vector<1x8x256xbf16>,
    %c0_i32 = arith.constant 0 : i32
    %34 = arith.cmpi eq, %arg1, %c0_i32 : i32
    %35 = arith.extui %34 : i1 to i32
    %c0_i32_69 = arith.constant 0 : i32
    %36 = arith.cmpi ne, %35, %c0_i32_69 : i32
    scf.if %36 {
      %cst_84 = arith.constant 0.000000e+00 : f32
      %50 = vector.broadcast %cst_84 : f32 to vector<1x8x1xf32>
      %c0_85 = arith.constant 0 : index
      %c0_86 = arith.constant 0 : index
      %c0_87 = arith.constant 0 : index
      %51 = vector.load %arg5[%c0_85, %c0_86, %c0_87] : memref<1x8x1xf32, #tpu.memory_space<vmem>>, vector<1x8x1xf32>
      tpu.vector_store %arg5[%c0_85, %c0_86, %c0_87], %50 {strides = array<i32>} : memref<1x8x1xf32, #tpu.memory_space<vmem>>, vector<1x8x1xf32>,
      %cst_88 = arith.constant 0.000000e+00 : f32
      %52 = vector.broadcast %cst_88 : f32 to vector<1x8x1xf32>
      %c0_89 = arith.constant 0 : index
      %c0_90 = arith.constant 0 : index
      %c0_91 = arith.constant 0 : index
      %53 = vector.load %arg6[%c0_89, %c0_90, %c0_91] : memref<1x8x1xf32, #tpu.memory_space<vmem>>, vector<1x8x1xf32>
      tpu.vector_store %arg6[%c0_89, %c0_90, %c0_91], %52 {strides = array<i32>} : memref<1x8x1xf32, #tpu.memory_space<vmem>>, vector<1x8x1xf32>,
    } else {
    }
    %c0_70 = arith.constant 0 : index
    %c0_71 = arith.constant 0 : index
    %c0_72 = arith.constant 0 : index
    %37 = vector.load %arg5[%c0_70, %c0_71, %c0_72] : memref<1x8x1xf32, #tpu.memory_space<vmem>>, vector<1x8x1xf32>
    %cst_73 = arith.constant dense<0.000000e+00> : vector<8xf32>
    %38 = vector.multi_reduction <add>, %30, %cst_73 [1] : vector<8x256xf32> to vector<8xf32>
    %39 = vector.shape_cast %38 : vector<8xf32> to vector<8x1xf32>
    %40 = vector.shape_cast %39 : vector<8x1xf32> to vector<1x8x1xf32>
    %41 = arith.addf %37, %40 : vector<1x8x1xf32>
    %c0_74 = arith.constant 0 : index
    %c0_75 = arith.constant 0 : index
    %c0_76 = arith.constant 0 : index
    %42 = vector.load %arg5[%c0_74, %c0_75, %c0_76] : memref<1x8x1xf32, #tpu.memory_space<vmem>>, vector<1x8x1xf32>
    tpu.vector_store %arg5[%c0_74, %c0_75, %c0_76], %41 {strides = array<i32>} : memref<1x8x1xf32, #tpu.memory_space<vmem>>, vector<1x8x1xf32>,
    %c0_77 = arith.constant 0 : index
    %c0_78 = arith.constant 0 : index
    %c0_79 = arith.constant 0 : index
    %43 = vector.load %arg6[%c0_77, %c0_78, %c0_79] : memref<1x8x1xf32, #tpu.memory_space<vmem>>, vector<1x8x1xf32>
    %44 = arith.mulf %30, %30 : vector<8x256xf32>
    %cst_80 = arith.constant dense<0.000000e+00> : vector<8xf32>
    %45 = vector.multi_reduction <add>, %44, %cst_80 [1] : vector<8x256xf32> to vector<8xf32>
    %46 = vector.shape_cast %45 : vector<8xf32> to vector<8x1xf32>
    %47 = vector.shape_cast %46 : vector<8x1xf32> to vector<1x8x1xf32>
    %48 = arith.addf %43, %47 : vector<1x8x1xf32>
    %c0_81 = arith.constant 0 : index
    %c0_82 = arith.constant 0 : index
    %c0_83 = arith.constant 0 : index
    %49 = vector.load %arg6[%c0_81, %c0_82, %c0_83] : memref<1x8x1xf32, #tpu.memory_space<vmem>>, vector<1x8x1xf32>
    tpu.vector_store %arg6[%c0_81, %c0_82, %c0_83], %48 {strides = array<i32>} : memref<1x8x1xf32, #tpu.memory_space<vmem>>, vector<1x8x1xf32>,
    return
  }
  func.func @transform_0(%arg0: i32, %arg1: i32) -> (i32, i32, i32, i32, i32) {
    %c0_i32 = arith.constant 0 : i32
    %c0_i32_0 = arith.constant 0 : i32
    %c0_i32_1 = arith.constant 0 : i32
    %c0_i32_2 = arith.constant 0 : i32
    return %arg0, %arg1, %c0_i32, %c0_i32_0, %c0_i32_1 : i32, i32, i32, i32, i32
  }
  func.func @transform_1(%arg0: i32, %arg1: i32) -> (i32, i32) {
    %c0_i32 = arith.constant 0 : i32
    %c0_i32_0 = arith.constant 0 : i32
    %c0_i32_1 = arith.constant 0 : i32
    return %c0_i32, %c0_i32_0 : i32, i32
  }
  func.func @transform_2(%arg0: i32, %arg1: i32) -> (i32, i32, i32) {
    %c0_i32 = arith.constant 0 : i32
    %c0_i32_0 = arith.constant 0 : i32
    return %arg0, %c0_i32, %arg1 : i32, i32, i32
  }
  func.func @transform_3(%arg0: i32, %arg1: i32) -> (i32, i32, i32) {
    %c0_i32 = arith.constant 0 : i32
    %c0_i32_0 = arith.constant 0 : i32
    %c0_i32_1 = arith.constant 0 : i32
    return %arg0, %c0_i32, %c0_i32_0 : i32, i32, i32
  }
  func.func @transform_4(%arg0: i32, %arg1: i32) -> (i32, i32, i32) {
    %c0_i32 = arith.constant 0 : i32
    %c0_i32_0 = arith.constant 0 : i32
    %c0_i32_1 = arith.constant 0 : i32
    return %arg0, %c0_i32, %c0_i32_0 : i32, i32, i32
  }
}

</mosaic_0001>

<bundles_post_ra>
// kernel: tpu_custom_call.1
= control target key start
LH: loop header
LB: loop body
LE: loop exit
PB: predicated region body
PF: predicated region fallthrough
CT: control target
= control target key end

     0   :  { %10 = vsyncpa [#allocation4], 0  ;;  %s4946_s0 = inlined_call_operand.vmem [shape: bf16[2,1,18,18,4], index: 0, kind: input, shape index: {}]   ;;  %s4947_s1 = inlined_call_operand.vmem [shape: bf16[8,36], index: 1, kind: input, shape index: {}]   ;;  %s4948_s2 = inlined_call_operand.hbm [shape: bf16[2,8,256], index: 2, kind: output, shape index: {0}]   ;;  %s4949_s3 = inlined_call_operand.vmem [shape: f32[2,8,1], index: 3, kind: output, shape index: {1}]   ;;  %s4950_s4 = inlined_call_operand.vmem [shape: f32[2,8,1], index: 4, kind: output, shape index: {2}]  }
   0x1   :  { %12 = vsyncpa [#allocation4 + $0x1], 0  ;;  %s4175_s15 = smov 0   ;;  %s4177_s16 = smov 0  }
   0x2   :  { %s4179_s17 = smov 0   ;;  %s4181_s18 = smov 0  }
   0x3   :  { %s4183_s19 = smov 0   ;;  %s4185_s20 = smov 0  }
   0x4 LB: > { %s3215_s21 = sadd.s32 4294967295, %s4138_s20   ;;  %s3216_s22 = sadd.s32 4294967294, %s4138_s20   ;;  %s4138_s20 = sphi %s4185_s20, %s18_s20   ;;  %s4134_s19 = sphi %s4183_s19, %s4957_s19   ;;  %s4130_s18 = sphi %s4181_s18, %s4956_s18   ;;  %s4126_s17 = sphi %s4179_s17, %s4955_s17   ;;  %s4122_s16 = sphi %s4177_s16, %s4954_s16   ;;  %s4118_s15 = sphi %s4175_s15, %s4953_s15  }
   0x5   : > { %s30_s23 = sadd.s32 1, %s4134_s19  ;;  %s88_s24 = sadd.s32 1, %s4126_s17 }
   0x6   : > { %p32_p0 = scmp.ge.s32.totalorder %s30_s23, 2  ;;  %p98_p1 = scmp.ne.s32.totalorder %s4126_s17, %s4122_s16 }
   0x7   : > { %p99_p2 = scmp.eq.s32.totalorder %s3215_s21, 1  ;;  %p104_p3 = scmp.ne.s32.totalorder %s4122_s16, %s4118_s15 }
   0x8   : > { %s4959_s23 = smov (%p32_p0, %s30_s23), 0  ;;  %p105_p5 = scmp.eq.s32.totalorder %s3216_s22, 1 }
   0x9   : > { %p4215_p4 = por %p99_p2, %p98_p1  ;;  %s83_s26 = ssub.s32 %s4134_s19, %s4959_s23 }
   0xa   : > { %p3219_p6 = scmp.ge.s32.totalorder %s4138_s20, 1  ;;  %p86_p7 = scmp.eq.s32.totalorder %s83_s26, 0 }
   0xb   : > { %p4222_p8 = por %p105_p5, %p104_p3  ;;  %p190_p9 = scmp.lt.s32.totalorder %s4138_s20, 3 }
   0xc   : > { %s4228_s28 = scalar_select %p86_p7, %s4126_s17, %s88_s24  }
   0xd   : > { %p191_p10 = pnand %p3219_p6, %p190_p9 }
   0xe   : > { %p228_p11 = scmp.lt.s32.totalorder (!%p191_p10), %s4130_s18, 1  ;;  %vm1002_vm0 = vcmask (!%p191_p10), 1046528   ;;  %s4140_s8 = smov (!%p191_p10), 12   ;;  %vm568_vm1 = vsmask.f32 (!%p191_p10), 7424  ;;  %vm375_vm2 = vcmask (!%p191_p10), 31744  }
   0xf   : > { %194 = sbr.rel (%p191_p10) target bundleno = 775 (0x307), region = 28  ;;  %s4141_s9 = smov (!%p191_p10), 20   ;;  %vm809_vm3 = vcmask (!%p191_p10), 64544   ;;  %vm1099_vm4 = vcmask (!%p191_p10), 97344   ;;  %vm1277_vm5 = vcmask (!%p191_p10), 130144   ;;  %vm1710_vm6 = vcmask (!%p191_p10), 162944  }
  0x10   : > { %s4142_s10 = smov (!%p191_p10), 8   ;;  %s4143_s11 = smov (!%p191_p10), 4   ;;  %vm1999_vm7 = vcmask (!%p191_p10), 195744   ;;  %vm2177_vm8 = vcmask (!%p191_p10), 228544   ;;  %vm2610_vm9 = vcmask (!%p191_p10), 261344   ;;  %vm2899_vm10 = vcmask (!%p191_p10), 294144  }
  0x11   : > { %s4144_s12 = smov (!%p191_p10), 16   ;;  %s4145_s13 = smov (!%p191_p10), 24   ;;  %vm2933_vm11 = vcmask (!%p191_p10), 293888   ;;  %vm3039_vm12 = vcmask (!%p191_p10), 7168  }
  0x12   : > { %s4146_s14 = smov (!%p191_p10), 28   ;;  %s4147_s21 = smov (!%p191_p10), 32  }
  0x13   : > { %s4149_s5 = smov (!%p191_p10), [#allocation3]  }
  0x16   : > { %s4232_s29 = scalar_select %p228_p11, %s4130_s18, 1 }
  0x18   : > { %s3755_s30 = smul.u32 216, %s4232_s29  ;;  %s3222_s26 = sshll.u32 %s4232_s29, 3 }
  0x19   : > { %s4883_s6 = scalar_lea.vmem %s4949_s3, %s3222_s26 }
  0x1a   : > { %s4238_s7 = scalar_lea.vmem %s4946_s0, %s3755_s30 }
  0x1b   : > { %v3820_v0 = vld [vmem:[%s4238_s7 + $0x6c] sm:$0xff]   ;;  %v3823_v3 = vld [vmem:[%s4238_s7 + $0x14] ss:$0 sps:$4 sm:$0x11]   ;;  %v3828_v4 = vld [vmem:[%s4238_s7] sm:$0xff]  }
  0x1c   : > { %v3821_v1 = vld [vmem:[%s4238_s7 + $0xc] sm:$0xff]   ;;  %1245 = vrot.lane.b32.xlu1 %v3820_v0, %s4140_s8  ;;  %v1904_v6 = vrot.slane %v3823_v3, 1  ;;  %v3824_v7 = vld [vmem:[%s4238_s7] sm:$0xfe]   ;;  %v570_v9 = vshrl.u32 %v3828_v4, 16  ;;  %v572_v13 = vshll.u32 %v3828_v4, 16 }
  0x1d   : > { %1229 = vrot.lane.b32.xlu0 %v3821_v1, %s4140_s8  ;;  %v3822_v2 = vld [vmem:[%s4238_s7 + $0xc] sm:$0xfe]   ;;  %v3825_v8 = vld [vmem:[%s4238_s7 + $0x8] ss:$0 sps:$4 sm:$0x11]   ;;  %v1003_v11 = vrot.slane %v3824_v7, 1 }
  0x1e   : > { %v1903_v5 = vrot.slane %v3822_v2, 1  ;;  %v3826_v12 = vld [vmem:[%s4238_s7 + $0x60] sm:$0xfe]   ;;  %v1004_v14 = vrot.slane %v3825_v8, 1  ;;  %v574_v17 = vrot.slane %v572_v13, 1  ;;  %v3834_v31 = vld [vmem:[%s4238_s7 + $0x6c] sm:$0xff]  }
  0x1f   : > { %v3827_v15 = vld [vmem:[%s4238_s7 + $0x68] ss:$0 sps:$4 sm:$0x11]   ;;  %v1027_v16 = vrot.slane %v3826_v12, 1  ;;  %v3830_v21 = vld [vmem:[%s4238_s7 + $0x6c] sm:$0xfe]  }
  0x20   : > { %v1905_v10 = vsel %vm1002_vm0, %v1903_v5, %v1904_v6  ;;  %v1005_v18 = vsel %vm1002_vm0, %v1003_v11, %v1004_v14  ;;  %v1028_v19 = vrot.slane %v3827_v15, 1  ;;  %v3829_v20 = vld [vmem:[%s4238_s7 + $0x8] ss:$0 sps:$4 sm:$0x11]   ;;  %v575_v23 = vor.u32 %v574_v17, %v570_v9  ;;  %v3832_v27 = vld [vmem:[%s4238_s7 + $0x60] sm:$0xff]   ;;  %v3836_v41 = vld [vmem:[%s4238_s7 + $0xc] sm:$0xff]  }
  0x21   : > { %1951 = vrot.lane.b32.xlu0 %v1905_v10, %s4141_s9  ;;  %1051 = vrot.lane.b32.xlu1 %v1005_v18, %s4142_s10  ;;  %v577_v24 = vshll.u32 %v3829_v20, 16  ;;  %v3831_v25 = vld [vmem:[%s4238_s7 + $0x74] ss:$0 sps:$4 sm:$0x11]   ;;  %v1927_v26 = vrot.slane %v3830_v21, 1  ;;  %v666_v32 = vshrl.u32 %v3832_v27, 16 }
  0x22   : > { %v1029_v22 = vsel %vm1002_vm0, %v1027_v16, %v1028_v19  ;;  %v1928_v29 = vrot.slane %v3831_v25, 1  ;;  %v3833_v30 = vld [vmem:[%s4238_s7 + $0x68] ss:$0 sps:$4 sm:$0x11]   ;;  %v668_v33 = vshll.u32 %v3832_v27, 16  ;;  %v1567_v39 = vshrl.u32 %v3834_v31, 16 }
  0x23   : > { %v579_v28 = vrot.slane %v577_v24, 1  ;;  %v673_v36 = vshll.u32 %v3833_v30, 16  ;;  %v3835_v37 = vld [vmem:[%s4238_s7 + $0x74] ss:$0 sps:$4 sm:$0x11]   ;;  %v1569_v40 = vshll.u32 %v3834_v31, 16 }
  0x24   : > { %v1929_v35 = vsel %vm1002_vm0, %v1927_v26, %v1928_v29  ;;  %v670_v38 = vrot.slane %v668_v33, 1  ;;  %v1574_v43 = vshll.u32 %v3835_v37, 16  ;;  %v3837_v46 = vld [vmem:[%s4238_s7 + $0x14] ss:$0 sps:$4 sm:$0x11]   ;;  %v1471_v47 = vshrl.u32 %v3836_v41, 16 }
  0x25   : > { %1067 = vrot.lane.b32.xlu1 %v1029_v22, %s4142_s10  ;;  %v580_v34 = vsel %vm568_vm1, %v575_v23, %v579_v28  ;;  %v675_v42 = vrot.slane %v673_v36, 1  ;;  %v1571_v45 = vrot.slane %v1569_v40, 1  ;;  %v1473_v48 = vshll.u32 %v3836_v41, 16  ;;  %v3838_v54 = vld [vmem:[%s4238_s7 + $0x78] sm:$0xff]   ;;  %v3848_v6 = vld [vmem:[%s4238_s7 + $0x6c] sm:$0xff]  }
  0x26   : > { %761 = vrot.lane.b32.xlu0 %v580_v34, %s4143_s11  ;;  %v671_v44 = vor.u32 %v670_v38, %v666_v32  ;;  %v1576_v49 = vrot.slane %v1574_v43, 1  ;;  %v1478_v53 = vshll.u32 %v3837_v46, 16  ;;  %v3840_v58 = vld [vmem:[%s4238_s7 + $0x78] sm:$0xff]   ;;  %v3841_v60 = vld [vmem:[%s4238_s7 + $0x80] ss:$0 sps:$4 sm:$0x11]  }
  0x27   : > { %v1572_v51 = vor.u32 %v1571_v45, %v1567_v39  ;;  %v1475_v52 = vrot.slane %v1473_v48, 1  ;;  %v3839_v59 = vld [vmem:[%s4238_s7 + $0x18] sm:$0xff]   ;;  %v2467_v63 = vshrl.u32 %v3840_v58, 16  ;;  %v2469_v0 = vshll.u32 %v3840_v58, 16  ;;  %v3850_v17 = vld [vmem:[%s4238_s7 + $0xc] sm:$0xff]  }
  0x28   : > { %v676_v50 = vsel %vm568_vm1, %v671_v44, %v675_v42  ;;  %v1480_v57 = vrot.slane %v1478_v53, 1  ;;  %v3842_v61 = vld [vmem:[%s4238_s7 + $0x18] sm:$0xff]   ;;  %v2474_v1 = vshll.u32 %v3841_v60, 16  ;;  %v3843_v2 = vld [vmem:[%s4238_s7 + $0x20] ss:$0 sps:$4 sm:$0x11]  }
  0x29   : > { %1967 = vrot.lane.b32.xlu1 %v1929_v35, %s4141_s9  ;;  %v1577_v55 = vsel %vm568_vm1, %v1572_v51, %v1576_v49  ;;  %v1476_v56 = vor.u32 %v1475_v52, %v1471_v47  ;;  %v2371_v3 = vshrl.u32 %v3842_v61, 16  ;;  %v2373_v4 = vshll.u32 %v3842_v61, 16  ;;  %v3844_v10 = vld [vmem:[%s4238_s7 + $0x78] sm:$0xfe]   ;;  %v3852_v37 = vld [vmem:[%s4238_s7 + $0x6c] sm:$0xfe]  }
  0x2a   : > { %777 = vrot.lane.b32.xlu0 %v676_v50, %s4143_s11  ;;  %v2471_v5 = vrot.slane %v2469_v0, 1  ;;  %v2476_v7 = vrot.slane %v2474_v1, 1  ;;  %v2378_v9 = vshll.u32 %v3843_v2, 16  ;;  %v3845_v12 = vld [vmem:[%s4238_s7 + $0x80] ss:$0 sps:$4 sm:$0x11]  }
  0x2b   : > { %v1481_v62 = vsel %vm568_vm1, %v1476_v56, %v1480_v57  ;;  %v2375_v8 = vrot.slane %v2373_v4, 1  ;;  %v678_v13 = vshrl.u32 %v3848_v6, 16  ;;  %v2827_v16 = vrot.slane %v3844_v10, 1  ;;  %v3846_v20 = vld [vmem:[%s4238_s7 + $0x18] sm:$0xfe]  }
  0x2c   : > { %v2472_v11 = vor.u32 %v2471_v5, %v2467_v63  ;;  %v2380_v15 = vrot.slane %v2378_v9, 1  ;;  %v2828_v19 = vrot.slane %v3845_v12, 1  ;;  %v3847_v21 = vld [vmem:[%s4238_s7 + $0x20] ss:$0 sps:$4 sm:$0x11]   ;;  %v2803_v24 = vrot.slane %v3846_v20, 1 }
  0x2d   : > { %1678 = vrot.lane.b32.xlu1 %v1577_v55, %s4144_s12  ;;  %v2376_v14 = vor.u32 %v2375_v8, %v2371_v3  ;;  %v2804_v25 = vrot.slane %v3847_v21, 1  ;;  %v3849_v26 = vld [vmem:[%s4238_s7 + $0x74] ss:$0 sps:$4 sm:$0x11]   ;;  %v680_v27 = vshll.u32 %v3848_v6, 16  ;;  %v582_v32 = vshrl.u32 %v3850_v17, 16 }
  0x2e   : > { %1662 = vrot.lane.b32.xlu0 %v1481_v62, %s4144_s12  ;;  %v2477_v18 = vsel %vm568_vm1, %v2472_v11, %v2476_v7  ;;  %v2829_v23 = vsel %vm1002_vm0, %v2827_v16, %v2828_v19  ;;  %v685_v30 = vshll.u32 %v3849_v26, 16  ;;  %v3851_v31 = vld [vmem:[%s4238_s7 + $0x14] ss:$0 sps:$4 sm:$0x11]   ;;  %v584_v33 = vshll.u32 %v3850_v17, 16  ;;  %v3856_v51 = vld [vmem:[%s4238_s7 + $0x78] sm:$0xff]  }
  0x2f   : > { %v2381_v22 = vsel %vm568_vm1, %v2376_v14, %v2380_v15  ;;  %v2805_v28 = vsel %vm1002_vm0, %v2803_v24, %v2804_v25  ;;  %v682_v29 = vrot.slane %v680_v27, 1  ;;  %v589_v36 = vshll.u32 %v3851_v31, 16  ;;  %v3853_v39 = vld [vmem:[%s4238_s7 + $0x74] ss:$0 sps:$4 sm:$0x11]   ;;  %v3858_v52 = vld [vmem:[%s4238_s7 + $0x78] sm:$0xff]  }
  0x30   : > { %v687_v35 = vrot.slane %v685_v30, 1  ;;  %v586_v38 = vrot.slane %v584_v33, 1  ;;  %v1030_v42 = vrot.slane %v3852_v37, 1  ;;  %v1031_v44 = vrot.slane %v3853_v39, 1  ;;  %v3854_v45 = vld [vmem:[%s4238_s7 + $0xc] sm:$0xfe]  }
  0x31   : > { %2145 = vrot.lane.b32.xlu1 %v3838_v54, %s4145_s13  ;;  %v683_v34 = vor.u32 %v682_v29, %v678_v13  ;;  %v591_v41 = vrot.slane %v589_v36, 1  ;;  %v3855_v46 = vld [vmem:[%s4238_s7 + $0x14] ss:$0 sps:$4 sm:$0x11]   ;;  %v1006_v49 = vrot.slane %v3854_v45, 1  ;;  %v1579_v55 = vshrl.u32 %v3858_v52, 16 }
  0x32   : > { %2129 = vrot.lane.b32.xlu0 %v3839_v59, %s4145_s13  ;;  %v587_v43 = vor.u32 %v586_v38, %v582_v32  ;;  %v1032_v48 = vsel %vm1002_vm0, %v1030_v42, %v1031_v44  ;;  %v1007_v50 = vrot.slane %v3855_v46, 1  ;;  %v3859_v54 = vld [vmem:[%s4238_s7 + $0x80] ss:$0 sps:$4 sm:$0x11]   ;;  %v1581_v56 = vshll.u32 %v3858_v52, 16  ;;  %v3860_v57 = vld [vmem:[%s4238_s7 + $0x18] sm:$0xff]  }
  0x33   : > { %v688_v40 = vsel %vm568_vm1, %v683_v34, %v687_v35  ;;  %v3857_v58 = vld [vmem:[%s4238_s7 + $0x18] sm:$0xff]   ;;  %v1586_v60 = vshll.u32 %v3859_v54, 16  ;;  %v3861_v61 = vld [vmem:[%s4238_s7 + $0x20] ss:$0 sps:$4 sm:$0x11]   ;;  %v1483_v62 = vshrl.u32 %v3860_v57, 16 }
  0x34   : > { %v592_v47 = vsel %vm568_vm1, %v587_v43, %v591_v41  ;;  %v1008_v53 = vsel %vm1002_vm0, %v1006_v49, %v1007_v50  ;;  %v1583_v59 = vrot.slane %v1581_v56, 1  ;;  %v1485_v63 = vshll.u32 %v3860_v57, 16  ;;  %v3862_v3 = vld [vmem:[%s4238_s7 + $0x78] sm:$0xfe]   ;;  %v3868_v17 = vld [vmem:[%s4238_s7 + $0x84] sm:$0xff]  }
  0x35   : > { %2578 = vrot.lane.b32.xlu1 %v2477_v18, %s4146_s14  ;;  %v1588_v1 = vrot.slane %v1586_v60, 1  ;;  %v1490_v2 = vshll.u32 %v3861_v61, 16  ;;  %v3863_v5 = vld [vmem:[%s4238_s7 + $0x80] ss:$0 sps:$4 sm:$0x11]   ;;  %v1930_v8 = vrot.slane %v3862_v3, 1 }
  0x36   : > { %2562 = vrot.lane.b32.xlu0 %v2381_v22, %s4146_s14  ;;  %v1584_v0 = vor.u32 %v1583_v59, %v1579_v55  ;;  %v1487_v4 = vrot.slane %v1485_v63, 1  ;;  %v1931_v10 = vrot.slane %v3863_v5, 1  ;;  %v3864_v11 = vld [vmem:[%s4238_s7 + $0x18] sm:$0xfe]   ;;  %v3866_v18 = vld [vmem:[%s4238_s7 + $0x84] sm:$0xff]   ;;  %v2479_v20 = vshrl.u32 %v3868_v17, 16 }
  0x37   : > { %v1492_v7 = vrot.slane %v1490_v2, 1  ;;  %v3865_v12 = vld [vmem:[%s4238_s7 + $0x20] ss:$0 sps:$4 sm:$0x11]   ;;  %v1906_v15 = vrot.slane %v3864_v11, 1  ;;  %v2481_v21 = vshll.u32 %v3868_v17, 16 }
  0x38   : > { %v1589_v6 = vsel %vm568_vm1, %v1584_v0, %v1588_v1  ;;  %v1488_v9 = vor.u32 %v1487_v4, %v1483_v62  ;;  %v1932_v14 = vsel %vm1002_vm0, %v1930_v8, %v1931_v10  ;;  %v1907_v16 = vrot.slane %v3865_v12, 1  ;;  %v3869_v19 = vld [vmem:[%s4238_s7 + $0x8c] ss:$0 sps:$4 sm:$0x11]   ;;  %v3870_v22 = vld [vmem:[%s4238_s7 + $0x24] sm:$0xff]   ;;  %v3876_v34 = vld [vmem:[%s4238_s7 + $0x78] sm:$0xff]  }
  0x39   : > { %2867 = vrot.lane.b32.xlu1 %v2829_v23, %s4147_s21  ;;  %v3867_v24 = vld [vmem:[%s4238_s7 + $0x24] sm:$0xff]   ;;  %v2483_v25 = vrot.slane %v2481_v21, 1  ;;  %v2486_v26 = vshll.u32 %v3869_v19, 16  ;;  %v3871_v27 = vld [vmem:[%s4238_s7 + $0x2c] ss:$0 sps:$4 sm:$0x11]  }
  0x3a   : > { %2851 = vrot.lane.b32.xlu0 %v2805_v28, %s4147_s21  ;;  %v1493_v13 = vsel %vm568_vm1, %v1488_v9, %v1492_v7  ;;  %v1908_v23 = vsel %vm1002_vm0, %v1906_v15, %v1907_v16  ;;  %v2383_v28 = vshrl.u32 %v3870_v22, 16  ;;  %v2385_v29 = vshll.u32 %v3870_v22, 16  ;;  %v3872_v33 = vld [vmem:[%s4238_s7 + $0x84] sm:$0xfe]   ;;  %v3880_v62 = vld [vmem:[%s4238_s7 + $0x78] sm:$0xfe]  }
  0x3b   : > { %v2484_v30 = vor.u32 %v2483_v25, %v2479_v20  ;;  %v2488_v31 = vrot.slane %v2486_v26, 1  ;;  %v2390_v32 = vshll.u32 %v3871_v27, 16  ;;  %v3873_v36 = vld [vmem:[%s4238_s7 + $0x8c] ss:$0 sps:$4 sm:$0x11]   ;;  %v2830_v39 = vrot.slane %v3872_v33, 1 }
  0x3c   : > { %v2387_v35 = vrot.slane %v2385_v29, 1  ;;  %v2831_v41 = vrot.slane %v3873_v36, 1  ;;  %v3874_v42 = vld [vmem:[%s4238_s7 + $0x24] sm:$0xfe]   ;;  %v690_v50 = vshrl.u32 %v3876_v34, 16  ;;  %v1033_v3 = vrot.slane %v3880_v62, 1 }
  0x3d   : > { %779 = vrot.lane.b32.xlu1 %v688_v40, %s4143_s11  ;;  %v2489_v37 = vsel %vm568_vm1, %v2484_v30, %v2488_v31  ;;  %v2392_v38 = vrot.slane %v2390_v32, 1  ;;  %v3875_v43 = vld [vmem:[%s4238_s7 + $0x2c] ss:$0 sps:$4 sm:$0x11]   ;;  %v2806_v45 = vrot.slane %v3874_v42, 1  ;;  %v3886_v7 = vld [vmem:[%s4238_s7 + $0x84] sm:$0xff]  }
  0x3e   : > { %763 = vrot.lane.b32.xlu0 %v592_v47, %s4143_s11  ;;  %v2388_v40 = vor.u32 %v2387_v35, %v2383_v28  ;;  %v2807_v46 = vrot.slane %v3875_v43, 1  ;;  %v3877_v47 = vld [vmem:[%s4238_s7 + $0x80] ss:$0 sps:$4 sm:$0x11]   ;;  %v2832_v49 = vsel %vm1002_vm0, %v2830_v39, %v2831_v41  ;;  %v3882_v5 = vld [vmem:[%s4238_s7 + $0x18] sm:$0xfe]  }
  0x3f   : > { %v697_v52 = vshll.u32 %v3877_v47, 16  ;;  %v3881_v63 = vld [vmem:[%s4238_s7 + $0x80] ss:$0 sps:$4 sm:$0x11]   ;;  %v1009_v10 = vrot.slane %v3882_v5, 1  ;;  %v3888_v11 = vld [vmem:[%s4238_s7 + $0x24] sm:$0xff]  }
  0x40   : > { %v2393_v44 = vsel %vm568_vm1, %v2388_v40, %v2392_v38  ;;  %v2808_v57 = vsel %vm1002_vm0, %v2806_v45, %v2807_v46  ;;  %v1034_v4 = vrot.slane %v3881_v63, 1  ;;  %v1593_v15 = vshll.u32 %v3886_v7, 16  ;;  %v3885_v21 = vld [vmem:[%s4238_s7 + $0x24] sm:$0xff]   ;;  %v3891_v30 = vld [vmem:[%s4238_s7 + $0x8c] ss:$0 sps:$4 sm:$0x11]  }
  0x41   : > { %1069 = vrot.lane.b32.xlu1 %v1032_v48, %s4142_s10  ;;  %v3878_v48 = vld [vmem:[%s4238_s7 + $0x18] sm:$0xff]   ;;  %v1495_v16 = vshrl.u32 %v3888_v11, 16  ;;  %v1497_v19 = vshll.u32 %v3888_v11, 16  ;;  %v3890_v29 = vld [vmem:[%s4238_s7 + $0x84] sm:$0xfe]   ;;  %v3896_v31 = vld [vmem:[%s4238_s7 + $0x90] sm:$0xff]  }
  0x42   : > { %1053 = vrot.lane.b32.xlu0 %v1008_v53, %s4142_s10  ;;  %v3879_v53 = vld [vmem:[%s4238_s7 + $0x20] ss:$0 sps:$4 sm:$0x11]   ;;  %v594_v55 = vshrl.u32 %v3878_v48, 16  ;;  %v596_v56 = vshll.u32 %v3878_v48, 16  ;;  %v1035_v9 = vsel %vm1002_vm0, %v1033_v3, %v1034_v4  ;;  %v1595_v20 = vrot.slane %v1593_v15, 1 }
  0x43   : > { %v601_v59 = vshll.u32 %v3879_v53, 16  ;;  %v3892_v35 = vld [vmem:[%s4238_s7 + $0x24] sm:$0xfe]   ;;  %v1934_v36 = vrot.slane %v3891_v30, 1  ;;  %v2491_v40 = vshrl.u32 %v3896_v31, 16  ;;  %v2493_v43 = vshll.u32 %v3896_v31, 16 }
  0x44   : > { %v598_v61 = vrot.slane %v596_v56, 1  ;;  %v1909_v39 = vrot.slane %v3892_v35, 1  ;;  %v3897_v45 = vld [vmem:[%s4238_s7 + $0x98] ss:$0 sps:$4 sm:$0x11]   ;;  %v3898_v48 = vld [vmem:[%s4238_s7 + $0x30] sm:$0xff]  }
  0x45   : > { %1247 = vrot.lane.b32.xlu1 %v3856_v51, %s4140_s8  ;;  %v692_v51 = vshll.u32 %v3876_v34, 16  ;;  %v603_v0 = vrot.slane %v601_v59, 1  ;;  %v1933_v34 = vrot.slane %v3890_v29, 1  ;;  %v2495_v46 = vrot.slane %v2493_v43, 1  ;;  %v3904_v56 = vld [vmem:[%s4238_s7 + $0x84] sm:$0xff]  }
  0x46   : > { %1231 = vrot.lane.b32.xlu0 %v3857_v58, %s4140_s8  ;;  %v699_v58 = vrot.slane %v697_v52, 1  ;;  %v599_v2 = vor.u32 %v598_v61, %v594_v55  ;;  %v2498_v52 = vshll.u32 %v3897_v45, 16  ;;  %v2395_v53 = vshrl.u32 %v3898_v48, 16  ;;  %v3901_v59 = vld [vmem:[%s4238_s7 + $0x98] ss:$0 sps:$4 sm:$0x11]  }
  0x47   : > { %v694_v54 = vrot.slane %v692_v51, 1  ;;  %v1935_v41 = vsel %vm1002_vm0, %v1933_v34, %v1934_v36  ;;  %v2496_v51 = vor.u32 %v2495_v46, %v2491_v40  ;;  %v3906_v62 = vld [vmem:[%s4238_s7 + $0x24] sm:$0xff]   ;;  %v3903_v4 = vld [vmem:[%s4238_s7 + $0x38] ss:$0 sps:$4 sm:$0x11]   ;;  %v702_v5 = vshrl.u32 %v3904_v56, 16 }
  0x48   : > { %v604_v8 = vsel %vm568_vm1, %v599_v2, %v603_v0  ;;  %v3902_v2 = vld [vmem:[%s4238_s7 + $0x30] sm:$0xfe]   ;;  %v606_v15 = vshrl.u32 %v3906_v62, 16  ;;  %v3910_v30 = vld [vmem:[%s4238_s7 + $0x24] sm:$0xfe]  }
  0x49   : > { %1680 = vrot.lane.b32.xlu1 %v1589_v6, %s4144_s12  ;;  %v695_v60 = vor.u32 %v694_v54, %v690_v50  ;;  %v3883_v6 = vld [vmem:[%s4238_s7 + $0x20] ss:$0 sps:$4 sm:$0x11]   ;;  %v3895_v50 = vld [vmem:[%s4238_s7 + $0x30] sm:$0xff]   ;;  %v2397_v54 = vshll.u32 %v3898_v48, 16  ;;  %v1012_v34 = vrot.slane %v3910_v30, 1 }
  0x4a   : > { %1664 = vrot.lane.b32.xlu0 %v1493_v13, %s4144_s12  ;;  %v1010_v12 = vrot.slane %v3883_v6, 1  ;;  %v3884_v13 = vld [vmem:[%s4238_s7 + $0x84] sm:$0xff]   ;;  %v2809_v6 = vrot.slane %v3902_v2, 1  ;;  %v3911_v31 = vld [vmem:[%s4238_s7 + $0x2c] ss:$0 sps:$4 sm:$0x11]  }
  0x4b   : > { %v700_v1 = vsel %vm568_vm1, %v695_v60, %v699_v58  ;;  %v3900_v58 = vld [vmem:[%s4238_s7 + $0x90] sm:$0xfe]   ;;  %v2399_v60 = vrot.slane %v2397_v54, 1  ;;  %v1013_v35 = vrot.slane %v3911_v31, 1  ;;  %v3924_v54 = vld [vmem:[%s4238_s7 + $0x9c] sm:$0xff]  }
  0x4c   : > { %v1011_v17 = vsel %vm1002_vm0, %v1009_v10, %v1010_v12  ;;  %v2833_v0 = vrot.slane %v3900_v58, 1  ;;  %v3905_v10 = vld [vmem:[%s4238_s7 + $0x8c] ss:$0 sps:$4 sm:$0x11]   ;;  %v3913_v48 = vld [vmem:[%s4238_s7 + $0x30] sm:$0xff]   ;;  %v2503_v2 = vshrl.u32 %v3924_v54, 16 }
  0x4d   : > { %1969 = vrot.lane.b32.xlu1 %v1932_v14, %s4141_s9  ;;  %v1591_v14 = vshrl.u32 %v3886_v7, 16  ;;  %v2400_v3 = vor.u32 %v2399_v60, %v2395_v53  ;;  %v704_v7 = vshll.u32 %v3904_v56, 16  ;;  %v1014_v40 = vsel %vm1002_vm0, %v1012_v34, %v1013_v35  ;;  %v3919_v53 = vld [vmem:[%s4238_s7 + $0x98] ss:$0 sps:$4 sm:$0x11]   ;;  %v3934_v30 = vld [vmem:[%s4238_s7 + $0x90] sm:$0xff]  }
  0x4e   : > { %1953 = vrot.lane.b32.xlu0 %v1908_v23, %s4141_s9  ;;  %v3889_v23 = vld [vmem:[%s4238_s7 + $0x2c] ss:$0 sps:$4 sm:$0x11]   ;;  %v3920_v60 = vld [vmem:[%s4238_s7 + $0x30] sm:$0xfe]  }
  0x4f   : > { %v1596_v25 = vor.u32 %v1595_v20, %v1591_v14  ;;  %v1502_v28 = vshll.u32 %v3889_v23, 16  ;;  %v706_v12 = vrot.slane %v704_v7, 1  ;;  %v3907_v14 = vld [vmem:[%s4238_s7 + $0x2c] ss:$0 sps:$4 sm:$0x11]  }
  0x50   : > { %v3909_v23 = vld [vmem:[%s4238_s7 + $0x8c] ss:$0 sps:$4 sm:$0x11]  }
  0x51   : > { %2147 = vrot.lane.b32.xlu1 %v3866_v18, %s4145_s13  ;;  %v3887_v18 = vld [vmem:[%s4238_s7 + $0x8c] ss:$0 sps:$4 sm:$0x11]   ;;  %v1504_v33 = vrot.slane %v1502_v28, 1  ;;  %v1037_v29 = vrot.slane %v3909_v23, 1 }
  0x52   : > { %2131 = vrot.lane.b32.xlu0 %v3867_v24, %s4145_s13  ;;  %v1598_v22 = vshll.u32 %v3887_v18, 16  ;;  %v1499_v24 = vrot.slane %v1497_v19, 1 }
  0x54   : > { %v1600_v26 = vrot.slane %v1598_v22, 1  ;;  %v1500_v27 = vor.u32 %v1499_v24, %v1495_v16  ;;  %v608_v16 = vshll.u32 %v3906_v62, 16  ;;  %v3908_v22 = vld [vmem:[%s4238_s7 + $0x84] sm:$0xfe]   ;;  %v3914_v24 = vld [vmem:[%s4238_s7 + $0x90] sm:$0xff]  }
  0x55   : > { %2580 = vrot.lane.b32.xlu1 %v2489_v37, %s4146_s14  ;;  %v3893_v37 = vld [vmem:[%s4238_s7 + $0x2c] ss:$0 sps:$4 sm:$0x11]   ;;  %v1036_v28 = vrot.slane %v3908_v22, 1  ;;  %v1603_v36 = vshrl.u32 %v3914_v24, 16 }
  0x56   : > { %2564 = vrot.lane.b32.xlu0 %v2393_v44, %s4146_s14  ;;  %v1601_v32 = vsel %vm568_vm1, %v1596_v25, %v1600_v26  ;;  %v1505_v38 = vsel %vm568_vm1, %v1500_v27, %v1504_v33  ;;  %v1910_v42 = vrot.slane %v3893_v37, 1  ;;  %v3894_v44 = vld [vmem:[%s4238_s7 + $0x90] sm:$0xff]   ;;  %v610_v20 = vrot.slane %v608_v16, 1  ;;  %v3929_v22 = vld [vmem:[%s4238_s7 + $0x9c] sm:$0xfe]  }
  0x57   : > { %v1038_v33 = vsel %vm1002_vm0, %v1036_v28, %v1037_v29  ;;  %v1605_v37 = vshll.u32 %v3914_v24, 16  ;;  %v2836_v29 = vrot.slane %v3929_v22, 1  ;;  %v3952_v22 = vld [vmem:[%s4238_s7 + $0x6c] sm:$0xff]  }
  0x58   : > { %v1911_v47 = vsel %vm1002_vm0, %v1909_v39, %v1910_v42  ;;  %v611_v26 = vor.u32 %v610_v20, %v606_v15  ;;  %v3916_v39 = vld [vmem:[%s4238_s7 + $0x30] sm:$0xff]   ;;  %v3923_v15 = vld [vmem:[%s4238_s7 + $0x3c] sm:$0xff]   ;;  %385 = vst.msk [vmem:[#allocation2 + $0x48] sm:$0xff] %vm375_vm2, %v3952_v22 }
  0x59   : > { %2869 = vrot.lane.b32.xlu1 %v2832_v49, %s4147_s21  ;;  %v3899_v49 = vld [vmem:[%s4238_s7 + $0x38] ss:$0 sps:$4 sm:$0x11]   ;;  %v1607_v42 = vrot.slane %v1605_v37, 1  ;;  %v1507_v45 = vshrl.u32 %v3916_v39, 16  ;;  %v1509_v46 = vshll.u32 %v3916_v39, 16 }
  0x5a   : > { %2853 = vrot.lane.b32.xlu0 %v2808_v57, %s4147_s21  ;;  %v2402_v55 = vshll.u32 %v3899_v49, 16  ;;  %v2500_v57 = vrot.slane %v2498_v52, 1  ;;  %v3918_v52 = vld [vmem:[%s4238_s7 + $0x90] sm:$0xfe]  }
  0x5b   : > { %v1936_v58 = vrot.slane %v3918_v52, 1  ;;  %v3935_v39 = vld [vmem:[%s4238_s7 + $0x98] ss:$0 sps:$4 sm:$0x11]  }
  0x5c   : > { %v2404_v61 = vrot.slane %v2402_v55, 1  ;;  %v2501_v63 = vsel %vm568_vm1, %v2496_v51, %v2500_v57 }
  0x5d   : > { %781 = vrot.lane.b32.xlu1 %v700_v1, %s4143_s11  ;;  %v2834_v1 = vrot.slane %v3901_v59, 1  ;;  %v1937_v59 = vrot.slane %v3919_v53, 1 }
  0x5e   : > { %765 = vrot.lane.b32.xlu0 %v604_v8, %s4143_s11  ;;  %v2405_v8 = vsel %vm568_vm1, %v2400_v3, %v2404_v61  ;;  %v3921_v61 = vld [vmem:[%s4238_s7 + $0x38] ss:$0 sps:$4 sm:$0x11]   ;;  %v2505_v3 = vshll.u32 %v3924_v54, 16 }
  0x5f   : > { %v2835_v11 = vsel %vm1002_vm0, %v2833_v0, %v2834_v1  ;;  %v1913_v0 = vrot.slane %v3921_v61, 1  ;;  %v1938_v1 = vsel %vm1002_vm0, %v1936_v58, %v1937_v59 }
  0x61   : > { %1071 = vrot.lane.b32.xlu1 %v1035_v9, %s4142_s10  ;;  %v2810_v9 = vrot.slane %v3903_v4, 1  ;;  %v3925_v4 = vld [vmem:[%s4238_s7 + $0xa4] ss:$0 sps:$4 sm:$0x11]  }
  0x62   : > { %1055 = vrot.lane.b32.xlu0 %v1011_v17, %s4142_s10  ;;  %v707_v17 = vor.u32 %v706_v12, %v702_v5  ;;  %v3926_v5 = vld [vmem:[%s4238_s7 + $0x3c] sm:$0xff]   ;;  %v3927_v12 = vld [vmem:[%s4238_s7 + $0x44] ss:$0 sps:$4 sm:$0x11]  }
  0x63   : > { %v2811_v18 = vsel %vm1002_vm0, %v2809_v6, %v2810_v9  ;;  %v2507_v9 = vrot.slane %v2505_v3, 1  ;;  %v2414_v20 = vshll.u32 %v3927_v12, 16  ;;  %v3945_v12 = vld [vmem:[%s4238_s7 + $0xa4] ss:$0 sps:$4 sm:$0x11]  }
  0x65   : > { %1249 = vrot.lane.b32.xlu1 %v3884_v13, %s4140_s8  ;;  %v709_v13 = vshll.u32 %v3905_v10, 16  ;;  %v2508_v16 = vor.u32 %v2507_v9, %v2503_v2  ;;  %v2416_v24 = vrot.slane %v2414_v20, 1  ;;  %v3944_v9 = vld [vmem:[%s4238_s7 + $0x9c] sm:$0xff]  }
  0x66   : > { %1233 = vrot.lane.b32.xlu0 %v3885_v21, %s4140_s8  ;;  %v613_v21 = vshll.u32 %v3907_v14, 16  ;;  %v2409_v14 = vshll.u32 %v3926_v5, 16 }
  0x67   : > { %v711_v19 = vrot.slane %v709_v13, 1  ;;  %v2407_v13 = vshrl.u32 %v3926_v5, 16 }
  0x68   : > { %v615_v27 = vrot.slane %v613_v21, 1  ;;  %v3933_v21 = vld [vmem:[%s4238_s7 + $0x60] sm:$0xff]  }
  0x69   : > { %1682 = vrot.lane.b32.xlu1 %v1601_v32, %s4144_s12  ;;  %v712_v25 = vsel %vm568_vm1, %v707_v17, %v711_v19  ;;  %v3928_v17 = vld [vmem:[%s4238_s7] sm:$0xff]   ;;  %v2411_v19 = vrot.slane %v2409_v14, 1  ;;  %384 = vst.msk [vmem:[#allocation2 + $0x40] sm:$0xff] %vm375_vm2, %v3933_v21  ;;  %v1615_v14 = vshrl.u32 %v3944_v9, 16 }
  0x6a   : > { %1666 = vrot.lane.b32.xlu0 %v1505_v38, %s4144_s12  ;;  %v616_v32 = vsel %vm568_vm1, %v611_v26, %v615_v27  ;;  %v3915_v38 = vld [vmem:[%s4238_s7 + $0x98] ss:$0 sps:$4 sm:$0x11]   ;;  %376 = vst.msk [vmem:[#allocation2] sm:$0xff] %vm375_vm2, %v3928_v17 }
  0x6b   : > { %v1610_v43 = vshll.u32 %v3915_v38, 16  ;;  %v2412_v23 = vor.u32 %v2411_v19, %v2407_v13  ;;  %v3947_v17 = vld [vmem:[%s4238_s7 + $0x44] ss:$0 sps:$4 sm:$0x11]  }
  0x6d   : > { %1971 = vrot.lane.b32.xlu1 %v1935_v41, %s4141_s9  ;;  %v3912_v41 = vld [vmem:[%s4238_s7 + $0x90] sm:$0xff]   ;;  %v1612_v49 = vrot.slane %v1610_v43, 1  ;;  %v2417_v34 = vsel %vm568_vm1, %v2412_v23, %v2416_v24 }
  0x6e   : > { %1955 = vrot.lane.b32.xlu0 %v1911_v47, %s4141_s9  ;;  %v1608_v47 = vor.u32 %v1607_v42, %v1603_v36  ;;  %v3936_v42 = vld [vmem:[%s4238_s7 + $0x30] sm:$0xff]  }
  0x70   : > { %v1613_v55 = vsel %vm568_vm1, %v1608_v47, %v1612_v49  ;;  %v620_v49 = vshll.u32 %v3936_v42, 16 }
  0x71   : > { %2149 = vrot.lane.b32.xlu1 %v3894_v44, %s4145_s13  ;;  %v3917_v44 = vld [vmem:[%s4238_s7 + $0x38] ss:$0 sps:$4 sm:$0x11]  }
  0x72   : > { %2133 = vrot.lane.b32.xlu0 %v3895_v50, %s4145_s13  ;;  %v1511_v50 = vrot.slane %v1509_v46, 1  ;;  %v1514_v51 = vshll.u32 %v3917_v44, 16  ;;  %v3937_v46 = vld [vmem:[%s4238_s7 + $0x38] ss:$0 sps:$4 sm:$0x11]   ;;  %v622_v54 = vrot.slane %v620_v49, 1 }
  0x73   : > { %v625_v53 = vshll.u32 %v3937_v46, 16  ;;  %v3958_v46 = vld [vmem:[%s4238_s7 + $0x48] sm:$0xff]  }
  0x74   : > { %v1512_v56 = vor.u32 %v1511_v50, %v1507_v45  ;;  %v1516_v57 = vrot.slane %v1514_v51, 1  ;;  %v721_v45 = vshll.u32 %v3935_v39, 16  ;;  %v3951_v39 = vld [vmem:[%s4238_s7 + $0x44] ss:$0 sps:$4 sm:$0x11]   ;;  %v3955_v49 = vld [vmem:[%s4238_s7 + $0x48] sm:$0xff]  }
  0x75   : > { %2582 = vrot.lane.b32.xlu1 %v2501_v63, %s4146_s14  ;;  %v1912_v63 = vrot.slane %v3920_v60, 1  ;;  %v627_v58 = vrot.slane %v625_v53, 1 }
  0x76   : > { %2566 = vrot.lane.b32.xlu0 %v2405_v8, %s4146_s14  ;;  %v1517_v62 = vsel %vm568_vm1, %v1512_v56, %v1516_v57  ;;  %v3922_v8 = vld [vmem:[%s4238_s7 + $0x9c] sm:$0xff]   ;;  %v723_v52 = vrot.slane %v721_v45, 1  ;;  %v3939_v56 = vld [vmem:[%s4238_s7 + $0x98] ss:$0 sps:$4 sm:$0x11]   ;;  %v3954_v45 = vld [vmem:[%s4238_s7 + $0xa8] sm:$0xff]  }
  0x77   : > { %v1914_v10 = vsel %vm1002_vm0, %v1912_v63, %v1913_v0  ;;  %v3940_v63 = vld [vmem:[%s4238_s7 + $0x30] sm:$0xfe]   ;;  %v3941_v0 = vld [vmem:[%s4238_s7 + $0x38] ss:$0 sps:$4 sm:$0x11]  }
  0x78   : > { %v1016_v5 = vrot.slane %v3941_v0, 1 }
  0x79   : > { %2871 = vrot.lane.b32.xlu1 %v2835_v11, %s4147_s21  ;;  %v2510_v11 = vshll.u32 %v3925_v4, 16  ;;  %v1015_v4 = vrot.slane %v3940_v63, 1 }
  0x7a   : > { %2855 = vrot.lane.b32.xlu0 %v2811_v18, %s4147_s21 }
  0x7b   : > { %v2512_v18 = vrot.slane %v2510_v11, 1  ;;  %v3943_v11 = vld [vmem:[%s4238_s7 + $0x3c] sm:$0xff]  }
  0x7d   : > { %783 = vrot.lane.b32.xlu1 %v712_v25, %s4143_s11  ;;  %v3930_v25 = vld [vmem:[%s4238_s7 + $0xa4] ss:$0 sps:$4 sm:$0x11]   ;;  %v2513_v28 = vsel %vm568_vm1, %v2508_v16, %v2512_v18  ;;  %v1622_v16 = vshll.u32 %v3945_v12, 16 }
  0x7e   : > { %767 = vrot.lane.b32.xlu0 %v616_v32, %s4143_s11  ;;  %v2837_v31 = vrot.slane %v3930_v25, 1  ;;  %v3931_v32 = vld [vmem:[%s4238_s7 + $0x3c] sm:$0xfe]   ;;  %v1526_v25 = vshll.u32 %v3947_v17, 16 }
  0x7f   : > { %v2812_v35 = vrot.slane %v3931_v32, 1  ;;  %v1624_v23 = vrot.slane %v1622_v16, 1  ;;  %v3963_v17 = vld [vmem:[%s4238_s7 + $0x50] ss:$0 sps:$4 sm:$0x11]  }
  0x80   : > { %v2838_v38 = vsel %vm1002_vm0, %v2836_v29, %v2837_v31  ;;  %v3948_v29 = vld [vmem:[%s4238_s7 + $0x9c] sm:$0xfe]   ;;  %v1528_v32 = vrot.slane %v1526_v25, 1  ;;  %v2816_v22 = vrot.slane %v3963_v17, 1 }
  0x81   : > { %1073 = vrot.lane.b32.xlu1 %v1038_v33, %s4142_s10  ;;  %v3932_v33 = vld [vmem:[%s4238_s7 + $0x44] ss:$0 sps:$4 sm:$0x11]  }
  0x82   : > { %1057 = vrot.lane.b32.xlu0 %v1014_v40, %s4142_s10  ;;  %v2813_v36 = vrot.slane %v3932_v33, 1  ;;  %v714_v40 = vshrl.u32 %v3934_v30, 16 }
  0x84   : > { %v2814_v47 = vsel %vm1002_vm0, %v2812_v35, %v2813_v36  ;;  %v1939_v35 = vrot.slane %v3948_v29, 1  ;;  %v3967_v29 = vld [vmem:[%s4238_s7 + $0x44] ss:$0 sps:$4 sm:$0x11]  }
  0x85   : > { %1251 = vrot.lane.b32.xlu1 %v3912_v41, %s4140_s8  ;;  %v716_v41 = vshll.u32 %v3934_v30, 16  ;;  %v3949_v30 = vld [vmem:[%s4238_s7 + $0xa4] ss:$0 sps:$4 sm:$0x11]  }
  0x86   : > { %1235 = vrot.lane.b32.xlu0 %v3913_v48, %s4140_s8  ;;  %v618_v48 = vshrl.u32 %v3936_v42, 16  ;;  %v1940_v36 = vrot.slane %v3949_v30, 1 }
  0x87   : > { %v718_v44 = vrot.slane %v716_v41, 1 }
  0x88   : > { %v623_v60 = vor.u32 %v622_v54, %v618_v48  ;;  %v1941_v41 = vsel %vm1002_vm0, %v1939_v35, %v1940_v36  ;;  %v2419_v54 = vshrl.u32 %v3958_v46, 16  ;;  %v637_v35 = vshll.u32 %v3967_v29, 16  ;;  %v3968_v36 = vld [vmem:[%s4238_s7 + $0x9c] sm:$0xfe]   ;;  %v3985_v29 = vld [vmem:[%s4238_s7 + $0x54] sm:$0xff]  }
  0x89   : > { %1684 = vrot.lane.b32.xlu1 %v1613_v55, %s4144_s12  ;;  %v719_v51 = vor.u32 %v718_v44, %v714_v40  ;;  %v3938_v55 = vld [vmem:[%s4238_s7 + $0x90] sm:$0xfe]   ;;  %v1916_v44 = vrot.slane %v3951_v39, 1  ;;  %v3974_v39 = vld [vmem:[%s4238_s7 + $0xa8] sm:$0xff]  }
  0x8a   : > { %1668 = vrot.lane.b32.xlu0 %v1517_v62, %s4144_s12  ;;  %v1039_v61 = vrot.slane %v3938_v55, 1  ;;  %v1040_v62 = vrot.slane %v3939_v56, 1 }
  0x8b   : > { %v724_v57 = vsel %vm568_vm1, %v719_v51, %v723_v52  ;;  %v3957_v51 = vld [vmem:[%s4238_s7 + $0xb0] ss:$0 sps:$4 sm:$0x11]  }
  0x8c   : > { %v1041_v3 = vsel %vm1002_vm0, %v1039_v61, %v1040_v62  ;;  %v2522_v56 = vshll.u32 %v3957_v51, 16 }
  0x8d   : > { %1973 = vrot.lane.b32.xlu1 %v1938_v1, %s4141_s9  ;;  %v628_v1 = vsel %vm568_vm1, %v623_v60, %v627_v58  ;;  %v2421_v58 = vshll.u32 %v3958_v46, 16  ;;  %v3970_v46 = vld [vmem:[%s4238_s7 + $0x3c] sm:$0xfe]  }
  0x8e   : > { %v4444_v6 = vpop.permute.xlu1 %1245  ;;  %1957 = vrot.lane.b32.xlu0 %v1914_v10, %s4141_s9  ;;  %v1017_v10 = vsel %vm1002_vm0, %v1015_v4, %v1016_v5  ;;  %v2524_v63 = vrot.slane %v2522_v56, 1  ;;  %v3964_v4 = vld [vmem:[%s4238_s7 + $0x9c] sm:$0xff]   ;;  %v1018_v51 = vrot.slane %v3970_v46, 1  ;;  %v1629_v56 = vshll.u32 %v3974_v39, 16 }
  0x8f   : > { %v1230_v7 = vpop.permute.xlu0 %1229  ;;  %v2423_v0 = vrot.slane %v2421_v58, 1  ;;  %v3973_v58 = vld [vmem:[%s4238_s7 + $0x48] sm:$0xff]   ;;  %v3991_v46 = vld [vmem:[%s4238_s7 + $0xbc] ss:$0 sps:$4 sm:$0x11]  }
  0x91   : > { %2151 = vrot.lane.b32.xlu1 %v3922_v8, %s4145_s13 }
  0x92   : > { %2135 = vrot.lane.b32.xlu0 %v3923_v15, %s4145_s13  ;;  %v1617_v15 = vshll.u32 %v3944_v9, 16 }
  0x93   : > { %v4459_v26 = vpop.permute.xlu0 %1951  ;;  %v1052_v27 = vpop.permute.xlu1 %1051 }
  0x94   : > { %v1619_v21 = vrot.slane %v1617_v15, 1 }
  0x95   : > { %2584 = vrot.lane.b32.xlu1 %v2513_v28, %s4146_s14 }
  0x96   : > { %2568 = vrot.lane.b32.xlu0 %v2417_v34, %s4146_s14  ;;  %v1620_v28 = vor.u32 %v1619_v21, %v1615_v14  ;;  %v3962_v14 = vld [vmem:[%s4238_s7 + $0x48] sm:$0xfe]   ;;  %v728_v21 = vshll.u32 %v3964_v4, 16 }
  0x97   : > { %v1068_v37 = vpop.permute.xlu1 %1067 }
  0x98   : > { %v762_v43 = vpop.permute.xlu0 %761  ;;  %v1625_v34 = vsel %vm568_vm1, %v1620_v28, %v1624_v23  ;;  %v3965_v23 = vld [vmem:[%s4238_s7 + $0xa4] ss:$0 sps:$4 sm:$0x11]   ;;  %v730_v25 = vrot.slane %v728_v21, 1 }
  0x99   : > { %810 = vst.msk [vmem:[#allocation2] sm:$0xff] %vm809_vm3, %v762_v43  ;;  %2873 = vrot.lane.b32.xlu1 %v2838_v38, %s4147_s21  ;;  %v3956_v43 = vld [vmem:[%s4238_s7 + $0xa8] sm:$0xff]   ;;  %v733_v28 = vshll.u32 %v3965_v23, 16 }
  0x9a   : > { %1100 = vst.msk [vmem:[#allocation2] sm:$0xff] %vm1099_vm4, %v1052_v27  ;;  %2857 = vrot.lane.b32.xlu0 %v2814_v47, %s4147_s21  ;;  %v2515_v52 = vshrl.u32 %v3956_v43, 16  ;;  %v2517_v53 = vshll.u32 %v3956_v43, 16 }
  0x9b   : > { %v1968_v50 = vpop.permute.xlu1 %1967  ;;  %1278 = vst.msk [vmem:[#allocation2] sm:$0xff] %vm1277_vm5, %v1230_v7  ;;  %v3942_v7 = vld [vmem:[%s4238_s7 + $0x9c] sm:$0xff]  }
  0x9c   : > { %v778_v59 = vpop.permute.xlu0 %777  ;;  %v2519_v55 = vrot.slane %v2517_v53, 1  ;;  %v3972_v53 = vld [vmem:[%s4238_s7 + $0xa8] sm:$0xff]  }
  0x9d   : > { %785 = vrot.lane.b32.xlu1 %v724_v57, %s4143_s11  ;;  %818 = vst.msk [vmem:[#allocation2 + $0x40] sm:$0xff] %vm809_vm3, %v778_v59  ;;  %v3959_v57 = vld [vmem:[%s4238_s7 + $0x50] ss:$0 sps:$4 sm:$0x11]  }
  0x9e   : > { %1108 = vst.msk [vmem:[#allocation2 + $0x40] sm:$0xff] %vm1099_vm4, %v1068_v37  ;;  %769 = vrot.lane.b32.xlu0 %v628_v1, %s4143_s11  ;;  %v3950_v37 = vld [vmem:[%s4238_s7 + $0x3c] sm:$0xfe]   ;;  %v2520_v62 = vor.u32 %v2519_v55, %v2515_v52  ;;  %v2426_v1 = vshll.u32 %v3959_v57, 16  ;;  %v1627_v55 = vshrl.u32 %v3974_v39, 16 }
  0x9f   : > { %v1679_v2 = vpop.permute.xlu1 %1678  ;;  %1286 = vst.msk [vmem:[#allocation2 + $0x40] sm:$0xff] %vm1277_vm5, %v4444_v6  ;;  %v3946_v6 = vld [vmem:[%s4238_s7 + $0x3c] sm:$0xff]   ;;  %v1915_v42 = vrot.slane %v3950_v37, 1 }
  0xa0   : > { %1719 = vst.msk [vmem:[#allocation2 + $0x40] sm:$0xff] %vm1710_vm6, %v1679_v2  ;;  %v1663_v8 = vpop.permute.xlu0 %1662  ;;  %v1519_v18 = vshrl.u32 %v3946_v6, 16  ;;  %v1521_v19 = vshll.u32 %v3946_v6, 16  ;;  %v3960_v2 = vld [vmem:[%s4238_s7 + $0xa8] sm:$0xfe]   ;;  %v2525_v5 = vsel %vm568_vm1, %v2520_v62, %v2524_v63  ;;  %v3982_v62 = vld [vmem:[%s4238_s7 + $0x78] sm:$0xff]  }
  0xa1   : > { %1075 = vrot.lane.b32.xlu1 %v1041_v3, %s4142_s10  ;;  %1711 = vst.msk [vmem:[#allocation2] sm:$0xff] %vm1710_vm6, %v1663_v8  ;;  %v1917_v48 = vsel %vm1002_vm0, %v1915_v42, %v1916_v44  ;;  %v3961_v3 = vld [vmem:[%s4238_s7 + $0xb0] ss:$0 sps:$4 sm:$0x11]   ;;  %v2428_v8 = vrot.slane %v2426_v1, 1  ;;  %v639_v42 = vrot.slane %v637_v35, 1 }
  0xa2   : > { %2008 = vst.msk [vmem:[#allocation2 + $0x40] sm:$0xff] %vm1999_vm7, %v1968_v50  ;;  %2000 = vst.msk [vmem:[#allocation2] sm:$0xff] %vm1999_vm7, %v4459_v26  ;;  %1059 = vrot.lane.b32.xlu0 %v1017_v10, %s4142_s10  ;;  %v1523_v24 = vrot.slane %v1521_v19, 1  ;;  %v3953_v26 = vld [vmem:[%s4238_s7 + $0xc] sm:$0xff]   ;;  %v2839_v10 = vrot.slane %v3960_v2, 1  ;;  %v1042_v44 = vrot.slane %v3968_v36, 1 }
  0xa3   : > { %v2146_v13 = vpop.permute.xlu1 %2145  ;;  %377 = vst.msk [vmem:[#allocation2 + $0x8] sm:$0xff] %vm375_vm2, %v3953_v26  ;;  %v3977_v1 = vld [vmem:[%s4238_s7 + $0x50] ss:$0 sps:$4 sm:$0x11]   ;;  %386 = vst.msk [vmem:[#allocation2 + $0x50] sm:$0xff] %vm375_vm2, %v3982_v62  ;;  %v3988_v36 = vld [vmem:[%s4238_s7 + $0x54] sm:$0xff]  }
  0xa4   : > { %2186 = vst.msk [vmem:[#allocation2 + $0x40] sm:$0xff] %vm2177_vm8, %v2146_v13  ;;  %v2130_v20 = vpop.permute.xlu0 %2129  ;;  %v1524_v31 = vor.u32 %v1523_v24, %v1519_v18  ;;  %v2840_v13 = vrot.slane %v3961_v3, 1  ;;  %v726_v18 = vshrl.u32 %v3964_v4, 16  ;;  %v3989_v39 = vld [vmem:[%s4238_s7 + $0x5c] ss:$0 sps:$4 sm:$0x11]  }
  0xa5   : > { %1253 = vrot.lane.b32.xlu1 %v3942_v7, %s4140_s8  ;;  %2178 = vst.msk [vmem:[#allocation2] sm:$0xff] %vm2177_vm8, %v2130_v20  ;;  %v2424_v7 = vor.u32 %v2423_v0, %v2419_v54  ;;  %v2815_v20 = vrot.slane %v3962_v14, 1 }
  0xa6   : > { %1237 = vrot.lane.b32.xlu0 %v3943_v11, %s4140_s8  ;;  %v1529_v38 = vsel %vm568_vm1, %v1524_v31, %v1528_v32  ;;  %v3966_v11 = vld [vmem:[%s4238_s7 + $0x3c] sm:$0xff]   ;;  %v2841_v19 = vsel %vm1002_vm0, %v2839_v10, %v2840_v13  ;;  %v731_v32 = vor.u32 %v730_v25, %v726_v18  ;;  %v3978_v10 = vld [vmem:[%s4238_s7 + $0xa8] sm:$0xfe]  }
  0xa7   : > { %v2579_v27 = vpop.permute.xlu1 %2578  ;;  %v2429_v15 = vsel %vm568_vm1, %v2424_v7, %v2428_v8  ;;  %v2817_v26 = vsel %vm1002_vm0, %v2815_v20, %v2816_v22  ;;  %v630_v30 = vshrl.u32 %v3966_v11, 16  ;;  %v632_v31 = vshll.u32 %v3966_v11, 16  ;;  %v3983_v11 = vld [vmem:[%s4238_s7 + $0x18] sm:$0xff]   ;;  %v3981_v20 = vld [vmem:[%s4238_s7 + $0x50] ss:$0 sps:$4 sm:$0x11]  }
  0xa8   : > { %2619 = vst.msk [vmem:[#allocation2 + $0x40] sm:$0xff] %vm2610_vm9, %v2579_v27  ;;  %v2563_v33 = vpop.permute.xlu0 %2562 }
  0xa9   : > { %2611 = vst.msk [vmem:[#allocation2] sm:$0xff] %vm2610_vm9, %v2563_v33  ;;  %1686 = vrot.lane.b32.xlu1 %v1625_v34, %s4144_s12  ;;  %v735_v33 = vrot.slane %v733_v28, 1  ;;  %v634_v34 = vrot.slane %v632_v31, 1  ;;  %v3984_v28 = vld [vmem:[%s4238_s7 + $0xb4] sm:$0xff]  }
  0xaa   : > { %1670 = vrot.lane.b32.xlu0 %v1529_v38, %s4144_s12  ;;  %v3969_v38 = vld [vmem:[%s4238_s7 + $0xa4] ss:$0 sps:$4 sm:$0x11]   ;;  %378 = vst.msk [vmem:[#allocation2 + $0x10] sm:$0xff] %vm375_vm2, %v3983_v11 }
  0xab   : > { %v2868_v40 = vpop.permute.xlu1 %2867  ;;  %v3987_v31 = vld [vmem:[%s4238_s7 + $0xbc] ss:$0 sps:$4 sm:$0x11]  }
  0xac   : > { %2908 = vst.msk [vmem:[#allocation2 + $0x40] sm:$0xff] %vm2899_vm10, %v2868_v40  ;;  %v2852_v47 = vpop.permute.xlu0 %2851  ;;  %v736_v40 = vsel %vm568_vm1, %v731_v32, %v735_v33  ;;  %v2534_v35 = vshll.u32 %v3987_v31, 16 }
  0xad   : > { %2900 = vst.msk [vmem:[#allocation2] sm:$0xff] %vm2899_vm10, %v2852_v47  ;;  %1975 = vrot.lane.b32.xlu1 %v1941_v41, %s4141_s9  ;;  %v635_v41 = vor.u32 %v634_v34, %v630_v30  ;;  %v3971_v47 = vld [vmem:[%s4238_s7 + $0x44] ss:$0 sps:$4 sm:$0x11]   ;;  %v3986_v30 = vld [vmem:[%s4238_s7 + $0xb4] sm:$0xff]  }
  0xae   : > { %1959 = vrot.lane.b32.xlu0 %v1917_v48, %s4141_s9  ;;  %v1019_v52 = vrot.slane %v3971_v47, 1  ;;  %v2527_v33 = vshrl.u32 %v3986_v30, 16  ;;  %v2529_v34 = vshll.u32 %v3986_v30, 16 }
  0xaf   : > { %v780_v50 = vpop.permute.xlu1 %779  ;;  %v640_v48 = vsel %vm568_vm1, %v635_v41, %v639_v42  ;;  %v2536_v41 = vrot.slane %v2534_v35, 1  ;;  %v2431_v42 = vshrl.u32 %v3988_v36, 16 }
  0xb0   : > { %819 = vst.msk [vmem:[#allocation2 + $0x48] sm:$0xff] %vm809_vm3, %v780_v50  ;;  %v764_v59 = vpop.permute.xlu0 %763  ;;  %v1020_v57 = vsel %vm1002_vm0, %v1018_v51, %v1019_v52 }
  0xb1   : > { %2153 = vrot.lane.b32.xlu1 %v3954_v45, %s4145_s13  ;;  %811 = vst.msk [vmem:[#allocation2 + $0x8] sm:$0xff] %vm809_vm3, %v764_v59  ;;  %v1043_v45 = vrot.slane %v3969_v38, 1  ;;  %v3975_v59 = vld [vmem:[%s4238_s7 + $0xb0] ss:$0 sps:$4 sm:$0x11]  }
  0xb2   : > { %2137 = vrot.lane.b32.xlu0 %v3955_v49, %s4145_s13  ;;  %v1634_v0 = vshll.u32 %v3975_v59, 16  ;;  %v3993_v59 = vld [vmem:[%s4238_s7 + $0x5c] ss:$0 sps:$4 sm:$0x11]  }
  0xb3   : > { %v1070_v60 = vpop.permute.xlu1 %1069  ;;  %v2925_v61 = vld [vmem:[#allocation2 + $0x40] sm:$0xff]  ;;  %v1044_v50 = vsel %vm1002_vm0, %v1042_v44, %v1043_v45  ;;  %v2438_v44 = vshll.u32 %v3989_v39, 16  ;;  %v3990_v45 = vld [vmem:[%s4238_s7 + $0xb4] sm:$0xfe]  }
  0xb4   : > { %1109 = vst.msk [vmem:[#allocation2 + $0x48] sm:$0xff] %vm1099_vm4, %v1070_v60  ;;  %3747 = vmatprep.subr.msk.bf16.mxu0 %vm2933_vm11, %v2925_v61  ;;  %v2917_v9 = vld [vmem:[#allocation2] sm:$0xff]  ;;  %v1054_v12 = vpop.permute.xlu0 %1053  ;;  %v3976_v60 = vld [vmem:[%s4238_s7 + $0x48] sm:$0xff]   ;;  %v1631_v61 = vrot.slane %v1629_v56, 1  ;;  %v1636_v7 = vrot.slane %v1634_v0, 1 }
  0xb5   : > { %2586 = vrot.lane.b32.xlu1 %v2525_v5, %s4146_s14  ;;  %v2938_v6 = vsel %vm2933_vm11, %v2917_v9, 0  ;;  %1101 = vst.msk [vmem:[#allocation2 + $0x8] sm:$0xff] %vm1099_vm4, %v1054_v12  ;;  %v1531_v2 = vshrl.u32 %v3976_v60, 16  ;;  %v1533_v3 = vshll.u32 %v3976_v60, 16  ;;  %v1538_v9 = vshll.u32 %v3977_v1, 16  ;;  %v3994_v60 = vld [vmem:[%s4238_s7 + $0xa8] sm:$0xff]  }
  0xb6   : > { %3730 = vmatpush3.bf16.xpose.msra.mxu0 %v2938_v6  ;;  %2570 = vrot.lane.b32.xlu0 %v2429_v15, %s4146_s14  ;;  %v1632_v5 = vor.u32 %v1631_v61, %v1627_v55  ;;  %v3979_v12 = vld [vmem:[%s4238_s7 + $0xb0] ss:$0 sps:$4 sm:$0x11]   ;;  %v2440_v51 = vrot.slane %v2438_v44, 1  ;;  %v2843_v55 = vrot.slane %v3991_v46, 1  ;;  %v2819_v1 = vrot.slane %v3993_v59, 1 }
  0xb7   : > { %v1248_v16 = vpop.permute.xlu1 %1247  ;;  %v1535_v8 = vrot.slane %v1533_v3, 1  ;;  %v1540_v15 = vrot.slane %v1538_v9, 1  ;;  %v1943_v18 = vrot.slane %v3979_v12, 1  ;;  %v738_v3 = vshrl.u32 %v3994_v60, 16 }
  0xb8   : > { %1287 = vst.msk [vmem:[#allocation2 + $0x48] sm:$0xff] %vm1277_vm5, %v1248_v16  ;;  %v1232_v24 = vpop.permute.xlu0 %1231  ;;  %v1637_v13 = vsel %vm568_vm1, %v1632_v5, %v1636_v7  ;;  %v1942_v16 = vrot.slane %v3978_v10, 1  ;;  %v740_v5 = vshll.u32 %v3994_v60, 16  ;;  %v3996_v7 = vld [vmem:[%s4238_s7 + $0x48] sm:$0xff]  }
  0xb9   : > { %2875 = vrot.lane.b32.xlu1 %v2841_v19, %s4147_s21  ;;  %1279 = vst.msk [vmem:[#allocation2 + $0x8] sm:$0xff] %vm1277_vm5, %v1232_v24  ;;  %v1536_v14 = vor.u32 %v1535_v8, %v1531_v2  ;;  %v3980_v19 = vld [vmem:[%s4238_s7 + $0x48] sm:$0xfe]   ;;  %v1919_v24 = vrot.slane %v3981_v20, 1  ;;  %v642_v12 = vshrl.u32 %v3996_v7, 16 }
  0xba   : > { %2859 = vrot.lane.b32.xlu0 %v2817_v26, %s4147_s21  ;;  %v1944_v22 = vsel %vm1002_vm0, %v1942_v16, %v1943_v18  ;;  %v1918_v23 = vrot.slane %v3980_v19, 1  ;;  %v3995_v2 = vld [vmem:[%s4238_s7 + $0xb0] ss:$0 sps:$4 sm:$0x11]   ;;  %v742_v11 = vrot.slane %v740_v5, 1 }
  0xbb   : > { %v1681_v27 = vpop.permute.xlu1 %1680  ;;  %v1541_v21 = vsel %vm568_vm1, %v1536_v14, %v1540_v15  ;;  %v745_v9 = vshll.u32 %v3995_v2, 16  ;;  %v3997_v10 = vld [vmem:[%s4238_s7 + $0x50] ss:$0 sps:$4 sm:$0x11]   ;;  %v3998_v19 = vld [vmem:[%s4238_s7 + $0xa8] sm:$0xfe]  }
  0xbc   : > { %1720 = vst.msk [vmem:[#allocation2 + $0x48] sm:$0xff] %vm1710_vm6, %v1681_v27  ;;  %v1665_v37 = vpop.permute.xlu0 %1664  ;;  %v1920_v26 = vsel %vm1002_vm0, %v1918_v23, %v1919_v24  ;;  %v649_v15 = vshll.u32 %v3997_v10, 16  ;;  %v743_v16 = vor.u32 %v742_v11, %v738_v3  ;;  %v3999_v20 = vld [vmem:[%s4238_s7 + $0xb0] ss:$0 sps:$4 sm:$0x11]   ;;  %v1045_v24 = vrot.slane %v3998_v19, 1 }
  0xbd   : > { %1712 = vst.msk [vmem:[#allocation2 + $0x8] sm:$0xff] %vm1710_vm6, %v1665_v37  ;;  %787 = vrot.lane.b32.xlu1 %v736_v40, %s4143_s11  ;;  %v2531_v40 = vrot.slane %v2529_v34, 1  ;;  %v747_v14 = vrot.slane %v745_v9, 1  ;;  %v4006_v34 = vld [vmem:[%s4238_s7 + $0x54] sm:$0xff]   ;;  %v4016_v9 = vld [vmem:[%s4238_s7 + $0xc0] sm:$0xff]  }
  0xbe   : > { %771 = vrot.lane.b32.xlu0 %v640_v48, %s4143_s11  ;;  %v1543_v39 = vshrl.u32 %v4006_v34, 16  ;;  %v1545_v44 = vshll.u32 %v4006_v34, 16  ;;  %v4009_v59 = vld [vmem:[%s4238_s7 + $0xbc] ss:$0 sps:$4 sm:$0x11]   ;;  %v4014_v10 = vld [vmem:[%s4238_s7 + $0xc0] sm:$0xff]  }
  0xbf   : > { %v1970_v43 = vpop.permute.xlu1 %1969  ;;  %v2532_v48 = vor.u32 %v2531_v40, %v2527_v33 }
  0xc0   : > { %2009 = vst.msk [vmem:[#allocation2 + $0x48] sm:$0xff] %vm1999_vm7, %v1970_v43  ;;  %v1954_v49 = vpop.permute.xlu0 %1953  ;;  %v2433_v43 = vshll.u32 %v3988_v36, 16  ;;  %v4002_v36 = vld [vmem:[%s4238_s7 + $0xb4] sm:$0xff]  }
  0xc1   : > { %2001 = vst.msk [vmem:[#allocation2 + $0x8] sm:$0xff] %vm1999_vm7, %v1954_v49  ;;  %1077 = vrot.lane.b32.xlu1 %v1044_v50, %s4142_s10  ;;  %v2537_v56 = vsel %vm568_vm1, %v2532_v48, %v2536_v41 }
  0xc2   : > { %1061 = vrot.lane.b32.xlu0 %v1020_v57, %s4142_s10  ;;  %v2435_v49 = vrot.slane %v2433_v43, 1  ;;  %v4005_v43 = vld [vmem:[%s4238_s7 + $0xbc] ss:$0 sps:$4 sm:$0x11]  }
  0xc3   : > { %v2148_v54 = vpop.permute.xlu1 %2147  ;;  %v1646_v48 = vshll.u32 %v4005_v43, 16  ;;  %v4022_v43 = vld [vmem:[%s4238_s7 + $0x60] sm:$0xfe]  }
  0xc4   : > { %2187 = vst.msk [vmem:[#allocation2 + $0x48] sm:$0xff] %vm2177_vm8, %v2148_v54  ;;  %v2132_v63 = vpop.permute.xlu0 %2131  ;;  %v2842_v54 = vrot.slane %v3990_v45, 1  ;;  %v2436_v57 = vor.u32 %v2435_v49, %v2431_v42  ;;  %v4003_v42 = vld [vmem:[%s4238_s7 + $0x54] sm:$0xff]   ;;  %v4007_v49 = vld [vmem:[%s4238_s7 + $0x5c] ss:$0 sps:$4 sm:$0x11]  }
  0xc5   : > { %2179 = vst.msk [vmem:[#allocation2 + $0x8] sm:$0xff] %vm2177_vm8, %v2132_v63  ;;  %1255 = vrot.lane.b32.xlu1 %v3972_v53, %s4140_s8 }
  0xc6   : > { %1239 = vrot.lane.b32.xlu0 %v3973_v58, %s4140_s8  ;;  %v3992_v58 = vld [vmem:[%s4238_s7 + $0x54] sm:$0xfe]   ;;  %v2844_v61 = vsel %vm1002_vm0, %v2842_v54, %v2843_v55  ;;  %v2441_v62 = vsel %vm568_vm1, %v2436_v57, %v2440_v51  ;;  %v4013_v51 = vld [vmem:[%s4238_s7 + $0x24] sm:$0xff]   ;;  %v1648_v54 = vrot.slane %v1646_v48, 1  ;;  %v2821_v48 = vrot.slane %v4022_v43, 1 }
  0xc7   : > { %v2581_v4 = vpop.permute.xlu1 %2580  ;;  %v2818_v0 = vrot.slane %v3992_v58, 1  ;;  %v4008_v57 = vld [vmem:[%s4238_s7 + $0xb4] sm:$0xfe]   ;;  %379 = vst.msk [vmem:[#allocation2 + $0x18] sm:$0xff] %vm375_vm2, %v4013_v51 }
  0xc8   : > { %2620 = vst.msk [vmem:[#allocation2 + $0x48] sm:$0xff] %vm2610_vm9, %v2581_v4  ;;  %v2565_v6 = vpop.permute.xlu0 %2564 }
  0xc9   : > { %2612 = vst.msk [vmem:[#allocation2 + $0x8] sm:$0xff] %vm2610_vm9, %v2565_v6  ;;  %1688 = vrot.lane.b32.xlu1 %v1637_v13, %s4144_s12  ;;  %v2820_v8 = vsel %vm1002_vm0, %v2818_v0, %v2819_v1  ;;  %v644_v6 = vshll.u32 %v3996_v7, 16  ;;  %v1946_v0 = vrot.slane %v4009_v59, 1  ;;  %v4011_v1 = vld [vmem:[%s4238_s7 + $0x5c] ss:$0 sps:$4 sm:$0x11]  }
  0xca   : > { %1672 = vrot.lane.b32.xlu0 %v1541_v21, %s4144_s12  ;;  %v651_v21 = vrot.slane %v649_v15, 1  ;;  %v1922_v7 = vrot.slane %v4011_v1, 1  ;;  %v2541_v15 = vshll.u32 %v4016_v9, 16  ;;  %v4029_v1 = vld [vmem:[%s4238_s7 + $0xbc] ss:$0 sps:$4 sm:$0x11]  }
  0xcb   : > { %v2870_v17 = vpop.permute.xlu1 %2869 }
  0xcc   : > { %2909 = vst.msk [vmem:[#allocation2 + $0x48] sm:$0xff] %vm2899_vm10, %v2870_v17  ;;  %v2854_v25 = vpop.permute.xlu0 %2853  ;;  %v646_v17 = vrot.slane %v644_v6, 1  ;;  %v4015_v6 = vld [vmem:[%s4238_s7 + $0x60] sm:$0xff]   ;;  %v2543_v19 = vrot.slane %v2541_v15, 1 }
  0xcd   : > { %2901 = vst.msk [vmem:[#allocation2 + $0x8] sm:$0xff] %vm2899_vm10, %v2854_v25  ;;  %1977 = vrot.lane.b32.xlu1 %v1944_v22, %s4141_s9  ;;  %v748_v22 = vsel %vm568_vm1, %v743_v16, %v747_v14  ;;  %v1046_v25 = vrot.slane %v3999_v20, 1  ;;  %v2539_v14 = vshrl.u32 %v4016_v9, 16  ;;  %v4018_v16 = vld [vmem:[%s4238_s7 + $0x60] sm:$0xff]   ;;  %v4030_v9 = vld [vmem:[%s4238_s7 + $0x54] sm:$0xfe]  }
  0xce   : > { %1961 = vrot.lane.b32.xlu0 %v1920_v26, %s4141_s9  ;;  %v647_v23 = vor.u32 %v646_v17, %v642_v12  ;;  %v4000_v26 = vld [vmem:[%s4238_s7 + $0x48] sm:$0xfe]   ;;  %v4032_v15 = vld [vmem:[%s4238_s7 + $0xc0] sm:$0xff]  }
  0xcf   : > { %v782_v27 = vpop.permute.xlu1 %781  ;;  %v1047_v31 = vsel %vm1002_vm0, %v1045_v24, %v1046_v25  ;;  %v2544_v25 = vor.u32 %v2543_v19, %v2539_v14 }
  0xd0   : > { %820 = vst.msk [vmem:[#allocation2 + $0x50] sm:$0xff] %vm809_vm3, %v782_v27  ;;  %v766_v32 = vpop.permute.xlu0 %765  ;;  %v652_v30 = vsel %vm568_vm1, %v647_v23, %v651_v21  ;;  %v2443_v21 = vshrl.u32 %v4018_v16, 16  ;;  %v4019_v23 = vld [vmem:[%s4238_s7 + $0x68] ss:$0 sps:$4 sm:$0x11]  }
  0xd1   : > { %812 = vst.msk [vmem:[#allocation2 + $0x10] sm:$0xff] %vm809_vm3, %v766_v32  ;;  %2155 = vrot.lane.b32.xlu1 %v3984_v28, %s4145_s13  ;;  %v4001_v28 = vld [vmem:[%s4238_s7 + $0x50] ss:$0 sps:$4 sm:$0x11]   ;;  %v1021_v32 = vrot.slane %v4000_v26, 1 }
  0xd2   : > { %2139 = vrot.lane.b32.xlu0 %v3985_v29, %s4145_s13  ;;  %v4004_v29 = vld [vmem:[%s4238_s7 + $0xb4] sm:$0xff]   ;;  %v1022_v35 = vrot.slane %v4001_v28, 1 }
  0xd3   : > { %v1072_v37 = vpop.permute.xlu1 %1071  ;;  %v2926_v38 = vld [vmem:[#allocation2 + $0x48] sm:$0xff] }
  0xd4   : > { %1110 = vst.msk [vmem:[#allocation2 + $0x50] sm:$0xff] %vm1099_vm4, %v1072_v37  ;;  %3748 = vmatprep.subr.msk.bf16.mxu0 %vm2933_vm11, %v2926_v38  ;;  %v1056_v47 = vpop.permute.xlu0 %1055  ;;  %v2918_v50 = vld [vmem:[#allocation2 + $0x8] sm:$0xff]  ;;  %v1639_v37 = vshrl.u32 %v4004_v29, 16  ;;  %v1641_v38 = vshll.u32 %v4004_v29, 16  ;;  %v1023_v40 = vsel %vm1002_vm0, %v1021_v32, %v1022_v35  ;;  %v4024_v29 = vld [vmem:[%s4238_s7 + $0xb4] sm:$0xff]  }
  0xd5   : > { %1102 = vst.msk [vmem:[#allocation2 + $0x10] sm:$0xff] %vm1099_vm4, %v1056_v47  ;;  %v2941_v52 = vsel %vm2933_vm11, %v2918_v50, 0  ;;  %2588 = vrot.lane.b32.xlu1 %v2537_v56, %s4146_s14  ;;  %v4012_v47 = vld [vmem:[%s4238_s7 + $0x84] sm:$0xff]   ;;  %v1547_v50 = vrot.slane %v1545_v44, 1  ;;  %v1550_v56 = vshll.u32 %v4007_v49, 16  ;;  %v752_v51 = vshll.u32 %v4024_v29, 16 }
  0xd6   : > { %3732 = vmatpush3.bf16.xpose.msra.mxu0 %v2941_v52  ;;  %2572 = vrot.lane.b32.xlu0 %v2441_v62, %s4146_s14  ;;  %v1643_v46 = vrot.slane %v1641_v38, 1  ;;  %387 = vst.msk [vmem:[#allocation2 + $0x58] sm:$0xff] %vm375_vm2, %v4012_v47  ;;  %v1945_v62 = vrot.slane %v4008_v57, 1  ;;  %v4023_v44 = vld [vmem:[%s4238_s7 + $0x68] ss:$0 sps:$4 sm:$0x11]  }
  0xd7   : > { %v1250_v53 = vpop.permute.xlu1 %1249  ;;  %v1548_v55 = vor.u32 %v1547_v50, %v1543_v39  ;;  %v2822_v49 = vrot.slane %v4023_v44, 1  ;;  %v4025_v50 = vld [vmem:[%s4238_s7 + $0xbc] ss:$0 sps:$4 sm:$0x11]  }
  0xd8   : > { %1288 = vst.msk [vmem:[#allocation2 + $0x50] sm:$0xff] %vm1277_vm5, %v1250_v53  ;;  %v1234_v63 = vpop.permute.xlu0 %1233  ;;  %v1644_v52 = vor.u32 %v1643_v46, %v1639_v37  ;;  %v1947_v5 = vsel %vm1002_vm0, %v1945_v62, %v1946_v0  ;;  %v750_v37 = vshrl.u32 %v4024_v29, 16 }
  0xd9   : > { %1280 = vst.msk [vmem:[#allocation2 + $0x10] sm:$0xff] %vm1277_vm5, %v1234_v63  ;;  %2877 = vrot.lane.b32.xlu1 %v2844_v61, %s4147_s21  ;;  %v1552_v61 = vrot.slane %v1550_v56, 1  ;;  %v4010_v63 = vld [vmem:[%s4238_s7 + $0x54] sm:$0xfe]  }
  0xda   : > { %2861 = vrot.lane.b32.xlu0 %v2820_v8, %s4147_s21  ;;  %v1649_v60 = vsel %vm568_vm1, %v1644_v52, %v1648_v54  ;;  %v2823_v52 = vsel %vm1002_vm0, %v2821_v48, %v2822_v49  ;;  %v754_v54 = vrot.slane %v752_v51, 1  ;;  %v4027_v56 = vld [vmem:[%s4238_s7 + $0x5c] ss:$0 sps:$4 sm:$0x11]  }
  0xdb   : > { %v1683_v4 = vpop.permute.xlu1 %1682  ;;  %v1553_v2 = vsel %vm568_vm1, %v1548_v55, %v1552_v61  ;;  %v757_v55 = vshll.u32 %v4025_v50, 16  ;;  %v661_v62 = vshll.u32 %v4027_v56, 16 }
  0xdc   : > { %1721 = vst.msk [vmem:[#allocation2 + $0x50] sm:$0xff] %vm1710_vm6, %v1683_v4  ;;  %v1667_v13 = vpop.permute.xlu0 %1666  ;;  %v1921_v4 = vrot.slane %v4010_v63, 1  ;;  %v4028_v63 = vld [vmem:[%s4238_s7 + $0xb4] sm:$0xfe]  }
  0xdd   : > { %1713 = vst.msk [vmem:[#allocation2 + $0x10] sm:$0xff] %vm1710_vm6, %v1667_v13  ;;  %789 = vrot.lane.b32.xlu1 %v748_v22, %s4143_s11  ;;  %v4017_v13 = vld [vmem:[%s4238_s7 + $0xc8] ss:$0 sps:$4 sm:$0x11]   ;;  %v2445_v22 = vshll.u32 %v4018_v16, 16  ;;  %v759_v61 = vrot.slane %v757_v55, 1 }
  0xde   : > { %773 = vrot.lane.b32.xlu0 %v652_v30, %s4143_s11  ;;  %v1923_v11 = vsel %vm1002_vm0, %v1921_v4, %v1922_v7  ;;  %v2546_v20 = vshll.u32 %v4017_v13, 16  ;;  %v2450_v30 = vshll.u32 %v4019_v23, 16  ;;  %v1024_v13 = vrot.slane %v4030_v9, 1  ;;  %v4034_v16 = vld [vmem:[%s4238_s7 + $0xc0] sm:$0xff]  }
  0xdf   : > { %v1972_v18 = vpop.permute.xlu1 %1971  ;;  %v4036_v23 = vld [vmem:[%s4238_s7 + $0x60] sm:$0xff]  }
  0xe0   : > { %2010 = vst.msk [vmem:[#allocation2 + $0x50] sm:$0xff] %vm1999_vm7, %v1972_v18  ;;  %v1956_v27 = vpop.permute.xlu0 %1955  ;;  %v2548_v26 = vrot.slane %v2546_v20, 1  ;;  %v2452_v38 = vrot.slane %v2450_v30, 1  ;;  %v4035_v20 = vld [vmem:[%s4238_s7 + $0xc8] ss:$0 sps:$4 sm:$0x11]  }
  0xe1   : > { %2002 = vst.msk [vmem:[#allocation2 + $0x10] sm:$0xff] %vm1999_vm7, %v1956_v27  ;;  %1079 = vrot.lane.b32.xlu1 %v1047_v31, %s4142_s10  ;;  %v2447_v27 = vrot.slane %v2445_v22, 1  ;;  %v1653_v22 = vshll.u32 %v4034_v16, 16  ;;  %v1557_v30 = vshll.u32 %v4036_v23, 16 }
  0xe2   : > { %1063 = vrot.lane.b32.xlu0 %v1023_v40, %s4142_s10  ;;  %v2549_v34 = vsel %vm568_vm1, %v2544_v25, %v2548_v26  ;;  %v4026_v40 = vld [vmem:[%s4238_s7 + $0x54] sm:$0xff]   ;;  %v1658_v26 = vshll.u32 %v4035_v20, 16 }
  0xe3   : > { %v2150_v33 = vpop.permute.xlu1 %2149  ;;  %v2448_v35 = vor.u32 %v2447_v27, %v2443_v21  ;;  %v654_v57 = vshrl.u32 %v4026_v40, 16  ;;  %v1651_v21 = vshrl.u32 %v4034_v16, 16  ;;  %v1655_v25 = vrot.slane %v1653_v22, 1  ;;  %v4037_v27 = vld [vmem:[%s4238_s7 + $0x68] ss:$0 sps:$4 sm:$0x11]  }
  0xe4   : > { %2188 = vst.msk [vmem:[#allocation2 + $0x50] sm:$0xff] %vm2177_vm8, %v2150_v33  ;;  %v2134_v41 = vpop.permute.xlu0 %2133  ;;  %v4020_v33 = vld [vmem:[%s4238_s7 + $0xc0] sm:$0xfe]  }
  0xe5   : > { %2180 = vst.msk [vmem:[#allocation2 + $0x10] sm:$0xff] %vm2177_vm8, %v2134_v41  ;;  %1257 = vrot.lane.b32.xlu1 %v4002_v36, %s4140_s8  ;;  %v4021_v36 = vld [vmem:[%s4238_s7 + $0xc8] ss:$0 sps:$4 sm:$0x11]   ;;  %v2845_v39 = vrot.slane %v4020_v33, 1  ;;  %v1660_v33 = vrot.slane %v1658_v26, 1 }
  0xe6   : > { %1241 = vrot.lane.b32.xlu0 %v4003_v42, %s4140_s8  ;;  %v2846_v42 = vrot.slane %v4021_v36, 1  ;;  %v4038_v36 = vld [vmem:[%s4238_s7 + $0xc0] sm:$0xfe]  }
  0xe7   : > { %v2583_v45 = vpop.permute.xlu1 %2582 }
  0xe8   : > { %2621 = vst.msk [vmem:[#allocation2 + $0x50] sm:$0xff] %vm2610_vm9, %v2583_v45  ;;  %v2567_v53 = vpop.permute.xlu0 %2566  ;;  %v2453_v45 = vsel %vm568_vm1, %v2448_v35, %v2452_v38  ;;  %v2847_v47 = vsel %vm1002_vm0, %v2845_v39, %v2846_v42  ;;  %v4039_v38 = vld [vmem:[%s4238_s7 + $0xc8] ss:$0 sps:$4 sm:$0x11]  }
  0xe9   : > { %2613 = vst.msk [vmem:[#allocation2 + $0x10] sm:$0xff] %vm2610_vm9, %v2567_v53  ;;  %1690 = vrot.lane.b32.xlu1 %v1649_v60, %s4144_s12  ;;  %v755_v60 = vor.u32 %v754_v54, %v750_v37  ;;  %v1559_v37 = vrot.slane %v1557_v30, 1  ;;  %v1949_v44 = vrot.slane %v4039_v38, 1  ;;  %v4044_v54 = vld [vmem:[%s4238_s7 + $0xcc] sm:$0xff]   ;;  %v4808_v38 = vld [vmem:[%s4947_s1] sm:$0xf] }
  0xea   : > { %1674 = vrot.lane.b32.xlu0 %v1553_v2, %s4144_s12  ;;  %3745 = vmatprep.mubr.msk.bf16.mxu0 %vm2933_vm11, %v4808_v38 }
  0xeb   : > { %v2872_v58 = vpop.permute.xlu1 %2871  ;;  %v760_v2 = vsel %vm568_vm1, %v755_v60, %v759_v61  ;;  %v4047_v60 = vld [vmem:[%s4238_s7 + $0xd4] ss:$0 sps:$4 sm:$0x11]   ;;  %v4048_v61 = vld [vmem:[%s4238_s7 + $0x6c] sm:$0xff]  }
  0xec   : > { %2910 = vst.msk [vmem:[#allocation2 + $0x50] sm:$0xff] %vm2899_vm10, %v2872_v58  ;;  %v2856_v3 = vpop.permute.xlu0 %2855  ;;  %v656_v58 = vshll.u32 %v4026_v40, 16 }
  0xed   : > { %2902 = vst.msk [vmem:[#allocation2 + $0x10] sm:$0xff] %vm2899_vm10, %v2856_v3  ;;  %1979 = vrot.lane.b32.xlu1 %v1947_v5, %s4141_s9  ;;  %v663_v3 = vrot.slane %v661_v62, 1  ;;  %v1048_v5 = vrot.slane %v4028_v63, 1 }
  0xee   : > { %1963 = vrot.lane.b32.xlu0 %v1923_v11, %s4141_s9  ;;  %v658_v0 = vrot.slane %v656_v58, 1  ;;  %v4045_v58 = vld [vmem:[%s4238_s7 + $0x6c] sm:$0xff]  }
  0xef   : > { %v784_v8 = vpop.permute.xlu1 %783 }
  0xf0   : > { %821 = vst.msk [vmem:[#allocation2 + $0x58] sm:$0xff] %vm809_vm3, %v784_v8  ;;  %v768_v12 = vpop.permute.xlu0 %767  ;;  %v659_v7 = vor.u32 %v658_v0, %v654_v57  ;;  %v1049_v8 = vrot.slane %v4029_v1, 1  ;;  %v2558_v1 = vshll.u32 %v4047_v60, 16 }
  0xf1   : > { %813 = vst.msk [vmem:[#allocation2 + $0x18] sm:$0xff] %vm809_vm3, %v768_v12  ;;  %2157 = vrot.lane.b32.xlu1 %v4014_v10, %s4145_s13  ;;  %v4031_v10 = vld [vmem:[%s4238_s7 + $0x5c] ss:$0 sps:$4 sm:$0x11]  }
  0xf2   : > { %2141 = vrot.lane.b32.xlu0 %v4015_v6, %s4145_s13  ;;  %v664_v12 = vsel %vm568_vm1, %v659_v7, %v663_v3  ;;  %v1050_v6 = vsel %vm1002_vm0, %v1048_v5, %v1049_v8  ;;  %v1025_v14 = vrot.slane %v4031_v10, 1  ;;  %v2455_v3 = vshrl.u32 %v4048_v61, 16  ;;  %v4054_v8 = vld [vmem:[%s4238_s7 + $0x9c] sm:$0xff]  }
  0xf3   : > { %v1074_v17 = vpop.permute.xlu1 %1073  ;;  %v2927_v18 = vld [vmem:[#allocation2 + $0x50] sm:$0xff]  ;;  %v2560_v10 = vrot.slane %v2558_v1, 1  ;;  %389 = vst.msk [vmem:[#allocation2 + $0x68] sm:$0xff] %vm375_vm2, %v4054_v8 }
  0xf4   : > { %1111 = vst.msk [vmem:[#allocation2 + $0x58] sm:$0xff] %vm1099_vm4, %v1074_v17  ;;  %3749 = vmatprep.subr.msk.bf16.mxu0 %vm2933_vm11, %v2927_v18  ;;  %v1058_v24 = vpop.permute.xlu0 %1057  ;;  %v2919_v28 = vld [vmem:[#allocation2 + $0x10] sm:$0xff]  ;;  %v1026_v18 = vsel %vm1002_vm0, %v1024_v13, %v1025_v14  ;;  %v4055_v14 = vld [vmem:[%s4238_s7 + $0x3c] sm:$0xff]  }
  0xf5   : > { %1103 = vst.msk [vmem:[#allocation2 + $0x18] sm:$0xff] %vm1099_vm4, %v1058_v24  ;;  %v2944_v31 = vsel %vm2933_vm11, %v2919_v28, 0  ;;  %2590 = vrot.lane.b32.xlu1 %v2549_v34, %s4146_s14  ;;  %v4033_v24 = vld [vmem:[%s4238_s7 + $0x60] sm:$0xff]   ;;  %v1555_v28 = vshrl.u32 %v4036_v23, 16  ;;  %v1562_v34 = vshll.u32 %v4037_v27, 16 }
  0xf6   : > { %3734 = vmatpush3.bf16.xpose.msra.mxu0 %v2944_v31  ;;  %2574 = vrot.lane.b32.xlu0 %v2453_v45, %s4146_s14  ;;  %v4042_v31 = vld [vmem:[%s4238_s7 + $0x90] sm:$0xff]   ;;  %v4040_v45 = vld [vmem:[%s4238_s7 + $0x60] sm:$0xfe]   ;;  %381 = vst.msk [vmem:[#allocation2 + $0x28] sm:$0xff] %vm375_vm2, %v4055_v14 }
  0xf7   : > { %v1252_v32 = vpop.permute.xlu1 %1251  ;;  %388 = vst.msk [vmem:[#allocation2 + $0x60] sm:$0xff] %vm375_vm2, %v4042_v31  ;;  %v1564_v40 = vrot.slane %v1562_v34, 1  ;;  %v1560_v42 = vor.u32 %v1559_v37, %v1555_v28  ;;  %v1924_v50 = vrot.slane %v4040_v45, 1  ;;  %v4050_v13 = vld [vmem:[%s4238_s7 + $0xcc] sm:$0xfe]   ;;  %v4059_v37 = vld [vmem:[%s4238_s7 + $0x54] sm:$0xff]  }
  0xf8   : > { %1289 = vst.msk [vmem:[#allocation2 + $0x58] sm:$0xff] %vm1277_vm5, %v1252_v32  ;;  %v1236_v41 = vpop.permute.xlu0 %1235  ;;  %v1656_v32 = vor.u32 %v1655_v25, %v1651_v21  ;;  %v2848_v20 = vrot.slane %v4050_v13, 1  ;;  %v4056_v21 = vld [vmem:[%s4238_s7 + $0xa8] sm:$0xff]   ;;  %v4053_v25 = vld [vmem:[%s4238_s7 + $0x74] ss:$0 sps:$4 sm:$0x11]  }
  0xf9   : > { %1281 = vst.msk [vmem:[#allocation2 + $0x18] sm:$0xff] %vm1277_vm5, %v1236_v41  ;;  %2879 = vrot.lane.b32.xlu1 %v2847_v47, %s4147_s21  ;;  %v1948_v41 = vrot.slane %v4038_v36, 1  ;;  %v1565_v48 = vsel %vm568_vm1, %v1560_v42, %v1564_v40  ;;  %v2825_v30 = vrot.slane %v4053_v25, 1  ;;  %v4057_v34 = vld [vmem:[%s4238_s7 + $0x48] sm:$0xff]  }
  0xfa   : > { %2863 = vrot.lane.b32.xlu0 %v2823_v52, %s4147_s21  ;;  %v1661_v39 = vsel %vm568_vm1, %v1656_v32, %v1660_v33  ;;  %v4043_v52 = vld [vmem:[%s4238_s7 + $0x30] sm:$0xff]   ;;  %390 = vst.msk [vmem:[#allocation2 + $0x70] sm:$0xff] %vm375_vm2, %v4056_v21  ;;  %382 = vst.msk [vmem:[#allocation2 + $0x30] sm:$0xff] %vm375_vm2, %v4057_v34 }
  0xfb   : > { %v1685_v46 = vpop.permute.xlu1 %1684  ;;  %v1950_v49 = vsel %vm1002_vm0, %v1948_v41, %v1949_v44  ;;  %380 = vst.msk [vmem:[#allocation2 + $0x20] sm:$0xff] %vm375_vm2, %v4043_v52  ;;  %383 = vst.msk [vmem:[#allocation2 + $0x38] sm:$0xff] %vm375_vm2, %v4059_v37 }
  0xfc   : > { %1722 = vst.msk [vmem:[#allocation2 + $0x58] sm:$0xff] %vm1710_vm6, %v1685_v46  ;;  %v1669_v53 = vpop.permute.xlu0 %1668  ;;  %v4041_v46 = vld [vmem:[%s4238_s7 + $0x68] ss:$0 sps:$4 sm:$0x11]  }
  0xfd   : > { %1714 = vst.msk [vmem:[#allocation2 + $0x18] sm:$0xff] %vm1710_vm6, %v1669_v53  ;;  %791 = vrot.lane.b32.xlu1 %v760_v2, %s4143_s11  ;;  %v1925_v51 = vrot.slane %v4041_v46, 1  ;;  %v4049_v2 = vld [vmem:[%s4238_s7 + $0x74] ss:$0 sps:$4 sm:$0x11]  }
  0xfe   : > { %775 = vrot.lane.b32.xlu0 %v664_v12, %s4143_s11  ;;  %s4891_s11 = scalar_lea.vmem %s4950_s4, %s3222_s26  ;;  %s4064_s26 = sshll.u32 %s4149_s5, 4  ;;  %s4065_s26 = int_to_ptr.vmem [resolvable:$false] %s4064_s26 }
  0xff   : > { %v1974_v59 = vpop.permute.xlu1 %1973  ;;  %v1926_v55 = vsel %vm1002_vm0, %v1924_v50, %v1925_v51 }
 0x100   : > { %2011 = vst.msk [vmem:[#allocation2 + $0x58] sm:$0xff] %vm1999_vm7, %v1974_v59  ;;  %v1958_v4 = vpop.permute.xlu0 %1957  ;;  %v4046_v59 = vld [vmem:[%s4238_s7 + $0xcc] sm:$0xff]  }
 0x101   : > { %2003 = vst.msk [vmem:[#allocation2 + $0x18] sm:$0xff] %vm1999_vm7, %v1958_v4  ;;  %1081 = vrot.lane.b32.xlu1 %v1050_v6, %s4142_s10  ;;  %v2551_v63 = vshrl.u32 %v4046_v59, 16  ;;  %v2553_v0 = vshll.u32 %v4046_v59, 16  ;;  %v2457_v4 = vshll.u32 %v4048_v61, 16 }
 0x102   : > { %1065 = vrot.lane.b32.xlu0 %v1026_v18, %s4142_s10  ;;  %v4051_v18 = vld [vmem:[%s4238_s7 + $0xd4] ss:$0 sps:$4 sm:$0x11]  }
 0x103   : > { %v2152_v11 = vpop.permute.xlu1 %2151  ;;  %v2555_v9 = vrot.slane %v2553_v0, 1  ;;  %v2459_v6 = vrot.slane %v2457_v4, 1  ;;  %v2849_v23 = vrot.slane %v4051_v18, 1 }
 0x104   : > { %2189 = vst.msk [vmem:[#allocation2 + $0x58] sm:$0xff] %vm2177_vm8, %v2152_v11  ;;  %v2136_v17 = vpop.permute.xlu0 %2135  ;;  %v2462_v11 = vshll.u32 %v4049_v2, 16 }
 0x105   : > { %2181 = vst.msk [vmem:[#allocation2 + $0x18] sm:$0xff] %vm2177_vm8, %v2136_v17  ;;  %1259 = vrot.lane.b32.xlu1 %v4032_v15, %s4140_s8  ;;  %v2556_v15 = vor.u32 %v2555_v9, %v2551_v63  ;;  %v2850_v28 = vsel %vm1002_vm0, %v2848_v20, %v2849_v23 }
 0x106   : > { %1243 = vrot.lane.b32.xlu0 %v4033_v24, %s4140_s8  ;;  %v2464_v16 = vrot.slane %v2462_v11, 1  ;;  %v4052_v24 = vld [vmem:[%s4238_s7 + $0x6c] sm:$0xfe]  }
 0x107   : > { %v2585_v19 = vpop.permute.xlu1 %2584  ;;  %v2561_v22 = vsel %vm568_vm1, %v2556_v15, %v2560_v10 }
 0x108   : > { %2622 = vst.msk [vmem:[#allocation2 + $0x58] sm:$0xff] %vm2610_vm9, %v2585_v19  ;;  %v2569_v29 = vpop.permute.xlu0 %2568  ;;  %v2460_v19 = vor.u32 %v2459_v6, %v2455_v3 }
 0x109   : > { %2614 = vst.msk [vmem:[#allocation2 + $0x18] sm:$0xff] %vm2610_vm9, %v2569_v29  ;;  %1692 = vrot.lane.b32.xlu1 %v1661_v39, %s4144_s12  ;;  %v2824_v29 = vrot.slane %v4052_v24, 1 }
 0x10a   : > { %1676 = vrot.lane.b32.xlu0 %v1565_v48, %s4144_s12  ;;  %v2465_v27 = vsel %vm568_vm1, %v2460_v19, %v2464_v16  ;;  %s3728_s12 = sshll.u32 %s4130_s18, 7 }
 0x10b   : > { %v2874_v35 = vpop.permute.xlu1 %2873  ;;  %v2826_v32 = vsel %vm1002_vm0, %v2824_v29, %v2825_v30  ;;  %s4899_s22 = scalar_lea.hbm %s4948_s2, %s3728_s12 }
 0x10c   : > { %2911 = vst.msk [vmem:[#allocation2 + $0x58] sm:$0xff] %vm2899_vm10, %v2874_v35  ;;  %v2858_v43 = vpop.permute.xlu0 %2857  ;;  %v4058_v35 = vld [vmem:[%s4238_s7 + $0xb4] sm:$0xff]   ;;  %s213_s7 = sand.u32 1, %s4122_s16  }
 0x10d   : > { %2903 = vst.msk [vmem:[#allocation2 + $0x18] sm:$0xff] %vm2899_vm10, %v2858_v43  ;;  %1981 = vrot.lane.b32.xlu1 %v1950_v49, %s4141_s9  ;;  %s3220_s8 = sshll.u32 %s213_s7, 3  ;;  %s3058_s24 = scalar_lea.sflag [#allocation4], %s213_s7 }
 0x10e   : > { %1965 = vrot.lane.b32.xlu0 %v1926_v55, %s4141_s9  ;;  %391 = vst.msk [vmem:[#allocation2 + $0x78] sm:$0xff] %vm375_vm2, %v4058_v35  ;;  %s215_s29 = scalar_lea.vmem [#allocation3], %s3220_s8  ;;  %s4066_s8 = scalar_lea.vmem %s4065_s26, 256 }
 0x10f   : > { %v786_v47 = vpop.permute.xlu1 %785 }
 0x110   : > { %822 = vst.msk [vmem:[#allocation2 + $0x60] sm:$0xff] %vm809_vm3, %v786_v47  ;;  %v770_v53 = vpop.permute.xlu0 %769 }
 0x111   : > { %814 = vst.msk [vmem:[#allocation2 + $0x20] sm:$0xff] %vm809_vm3, %v770_v53  ;;  %2159 = vrot.lane.b32.xlu1 %v4044_v54, %s4145_s13 }
 0x112   : > { %2143 = vrot.lane.b32.xlu0 %v4045_v58, %s4145_s13  ;;  %s3082_s13 = sshll.u32 %s215_s29, 4  ;;  %s3083_s13 = int_to_ptr.vmem [resolvable:$true] %s3082_s13 }
 0x113   : > { %v1076_v56 = vpop.permute.xlu1 %1075  ;;  %v2928_v57 = vld [vmem:[#allocation2 + $0x58] sm:$0xff]  ;;  %s4060_s30 = scalar_lea.vmem %s3083_s13, 128  ;;  %p4067_p1 = scmp.lt.s32.totalorder %s3083_s13, %s4065_s26 }
 0x114   : > { %1112 = vst.msk [vmem:[#allocation2 + $0x60] sm:$0xff] %vm1099_vm4, %v1076_v56  ;;  %3750 = vmatprep.subr.msk.bf16.mxu0 %vm2933_vm11, %v2928_v57  ;;  %v1060_v62 = vpop.permute.xlu0 %1059  ;;  %v2920_v5 = vld [vmem:[#allocation2 + $0x18] sm:$0xff]  ;;  %p4061_p12 = scmp.ne.s32.totalorder %s3083_s13, %s4060_s30  ;;  %p4068_p2 = scmp.lt.s32.totalorder %s4066_s8, %s4060_s30 }
 0x115   : > { %1104 = vst.msk [vmem:[#allocation2 + $0x20] sm:$0xff] %vm1099_vm4, %v1060_v62  ;;  %v2947_v12 = vsel %vm2933_vm11, %v2920_v5, 0  ;;  %2592 = vrot.lane.b32.xlu1 %v2561_v22, %s4146_s14 }
 0x116   : > { %3736 = vmatpush3.bf16.xpose.msra.mxu0 %v2947_v12  ;;  %2576 = vrot.lane.b32.xlu0 %v2465_v27, %s4146_s14  ;;  %p4062_p13 = pnand %p4061_p12, %p4215_p4  ;;  %p4069_p3 = por %p4068_p2, %p4067_p1 }
 0x117   : > { %v1254_v7 = vpop.permute.xlu1 %1253 }
 0x118   : > { %1290 = vst.msk [vmem:[#allocation2 + $0x60] sm:$0xff] %vm1277_vm5, %v1254_v7  ;;  %v1238_v17 = vpop.permute.xlu0 %1237  ;;  %p4063_p0 = pneg %p4062_p13 }
 0x119   : > { %1282 = vst.msk [vmem:[#allocation2 + $0x20] sm:$0xff] %vm1277_vm5, %v1238_v17  ;;  %2881 = vrot.lane.b32.xlu1 %v2850_v28, %s4147_s21 }
 0x11a   : > { %2865 = vrot.lane.b32.xlu0 %v2826_v32, %s4147_s21  ;;  %p4070_p5 = pnand %p4069_p3, %p4063_p0 }
 0x11b   : > { %v1687_v26 = vpop.permute.xlu1 %1686 }
 0x11c   : > { %1723 = vst.msk [vmem:[#allocation2 + $0x60] sm:$0xff] %vm1710_vm6, %v1687_v26  ;;  %v1671_v31 = vpop.permute.xlu0 %1670 }
 0x11d   : > { %1715 = vst.msk [vmem:[#allocation2 + $0x20] sm:$0xff] %vm1710_vm6, %v1671_v31 }
 0x11f   : > { %v1976_v33 = vpop.permute.xlu1 %1975 }
 0x120   : > { %2012 = vst.msk [vmem:[#allocation2 + $0x60] sm:$0xff] %vm1999_vm7, %v1976_v33  ;;  %v1960_v36 = vpop.permute.xlu0 %1959 }
 0x121   : > { %2004 = vst.msk [vmem:[#allocation2 + $0x20] sm:$0xff] %vm1999_vm7, %v1960_v36 }
 0x123   : > { %v2154_v39 = vpop.permute.xlu1 %2153 }
 0x124   : > { %2190 = vst.msk [vmem:[#allocation2 + $0x60] sm:$0xff] %vm2177_vm8, %v2154_v39  ;;  %v2138_v40 = vpop.permute.xlu0 %2137 }
 0x125   : > { %2182 = vst.msk [vmem:[#allocation2 + $0x20] sm:$0xff] %vm2177_vm8, %v2138_v40 }
 0x127   : > { %v2587_v41 = vpop.permute.xlu1 %2586 }
 0x128   : > { %2623 = vst.msk [vmem:[#allocation2 + $0x60] sm:$0xff] %vm2610_vm9, %v2587_v41  ;;  %v2571_v42 = vpop.permute.xlu0 %2570 }
 0x129   : > { %2615 = vst.msk [vmem:[#allocation2 + $0x20] sm:$0xff] %vm2610_vm9, %v2571_v42  ;;  %v4148_v42 = vmov 0.0  }
 0x12a   : > { %3040 = vst.msk [vmem:[%s4883_s6] sm:$0xff] %vm3039_vm12, %v4148_v42  ;;  %3041 = vst.msk [vmem:[%s4891_s11] sm:$0xff] %vm3039_vm12, %v4148_v42 }
 0x12b   : > { %v2876_v43 = vpop.permute.xlu1 %2875 }
 0x12c   : > { %2912 = vst.msk [vmem:[#allocation2 + $0x60] sm:$0xff] %vm2899_vm10, %v2876_v43  ;;  %v2860_v44 = vpop.permute.xlu0 %2859 }
 0x12d   : > { %2904 = vst.msk [vmem:[#allocation2 + $0x20] sm:$0xff] %vm2899_vm10, %v2860_v44 }
 0x12f   : > { %v788_v45 = vpop.permute.xlu1 %787 }
 0x130   : > { %823 = vst.msk [vmem:[#allocation2 + $0x68] sm:$0xff] %vm809_vm3, %v788_v45  ;;  %v772_v46 = vpop.permute.xlu0 %771 }
 0x131   : > { %815 = vst.msk [vmem:[#allocation2 + $0x28] sm:$0xff] %vm809_vm3, %v772_v46 }
 0x133   : > { %v2929_v47 = vld [vmem:[#allocation2 + $0x60] sm:$0xff]  ;;  %v1078_v48 = vpop.permute.xlu1 %1077 }
 0x134   : > { %3751 = vmatprep.subr.msk.bf16.mxu0 %vm2933_vm11, %v2929_v47  ;;  %v2921_v49 = vld [vmem:[#allocation2 + $0x20] sm:$0xff]  ;;  %1113 = vst.msk [vmem:[#allocation2 + $0x68] sm:$0xff] %vm1099_vm4, %v1078_v48  ;;  %v1062_v51 = vpop.permute.xlu0 %1061 }
 0x135   : > { %v2950_v50 = vsel %vm2933_vm11, %v2921_v49, 0  ;;  %1105 = vst.msk [vmem:[#allocation2 + $0x28] sm:$0xff] %vm1099_vm4, %v1062_v51 }
 0x136   : > { %3738 = vmatpush3.bf16.xpose.msra.mxu0 %v2950_v50 }
 0x137   : > { %v1256_v52 = vpop.permute.xlu1 %1255 }
 0x138   : > { %1291 = vst.msk [vmem:[#allocation2 + $0x68] sm:$0xff] %vm1277_vm5, %v1256_v52  ;;  %v1240_v53 = vpop.permute.xlu0 %1239 }
 0x139   : > { %1283 = vst.msk [vmem:[#allocation2 + $0x28] sm:$0xff] %vm1277_vm5, %v1240_v53 }
 0x13b   : > { %v1689_v54 = vpop.permute.xlu1 %1688 }
 0x13c   : > { %1724 = vst.msk [vmem:[#allocation2 + $0x68] sm:$0xff] %vm1710_vm6, %v1689_v54  ;;  %v1673_v55 = vpop.permute.xlu0 %1672 }
 0x13d   : > { %1716 = vst.msk [vmem:[#allocation2 + $0x28] sm:$0xff] %vm1710_vm6, %v1673_v55 }
 0x13f   : > { %v1978_v56 = vpop.permute.xlu1 %1977 }
 0x140   : > { %2013 = vst.msk [vmem:[#allocation2 + $0x68] sm:$0xff] %vm1999_vm7, %v1978_v56  ;;  %v1962_v57 = vpop.permute.xlu0 %1961 }
 0x141   : > { %2005 = vst.msk [vmem:[#allocation2 + $0x28] sm:$0xff] %vm1999_vm7, %v1962_v57 }
 0x143   : > { %v2156_v58 = vpop.permute.xlu1 %2155 }
 0x144   : > { %2191 = vst.msk [vmem:[#allocation2 + $0x68] sm:$0xff] %vm2177_vm8, %v2156_v58  ;;  %v2140_v59 = vpop.permute.xlu0 %2139 }
 0x145   : > { %2183 = vst.msk [vmem:[#allocation2 + $0x28] sm:$0xff] %vm2177_vm8, %v2140_v59 }
 0x147   : > { %v2589_v60 = vpop.permute.xlu1 %2588 }
 0x148   : > { %2624 = vst.msk [vmem:[#allocation2 + $0x68] sm:$0xff] %vm2610_vm9, %v2589_v60  ;;  %v2573_v61 = vpop.permute.xlu0 %2572 }
 0x149   : > { %2616 = vst.msk [vmem:[#allocation2 + $0x28] sm:$0xff] %vm2610_vm9, %v2573_v61 }
 0x14b   : > { %v2878_v62 = vpop.permute.xlu1 %2877 }
 0x14c   : > { %2913 = vst.msk [vmem:[#allocation2 + $0x68] sm:$0xff] %vm2899_vm10, %v2878_v62  ;;  %v2862_v63 = vpop.permute.xlu0 %2861 }
 0x14d   : > { %2905 = vst.msk [vmem:[#allocation2 + $0x28] sm:$0xff] %vm2899_vm10, %v2862_v63 }
 0x14f   : > { %v790_v0 = vpop.permute.xlu1 %789 }
 0x150   : > { %824 = vst.msk [vmem:[#allocation2 + $0x70] sm:$0xff] %vm809_vm3, %v790_v0  ;;  %v774_v1 = vpop.permute.xlu0 %773 }
 0x151   : > { %816 = vst.msk [vmem:[#allocation2 + $0x30] sm:$0xff] %vm809_vm3, %v774_v1 }
 0x153   : > { %v2930_v2 = vld [vmem:[#allocation2 + $0x68] sm:$0xff]  ;;  %v1080_v3 = vpop.permute.xlu1 %1079 }
 0x154   : > { %3752 = vmatprep.subr.msk.bf16.mxu0 %vm2933_vm11, %v2930_v2  ;;  %1114 = vst.msk [vmem:[#allocation2 + $0x70] sm:$0xff] %vm1099_vm4, %v1080_v3  ;;  %v2922_v4 = vld [vmem:[#allocation2 + $0x28] sm:$0xff]  ;;  %v1064_v5 = vpop.permute.xlu0 %1063 }
 0x155   : > { %v2953_v7 = vsel %vm2933_vm11, %v2922_v4, 0  ;;  %1106 = vst.msk [vmem:[#allocation2 + $0x30] sm:$0xff] %vm1099_vm4, %v1064_v5 }
 0x156   : > { %3740 = vmatpush3.bf16.xpose.msra.mxu0 %v2953_v7 }
 0x157   : > { %v1258_v8 = vpop.permute.xlu1 %1257 }
 0x158   : > { %1292 = vst.msk [vmem:[#allocation2 + $0x70] sm:$0xff] %vm1277_vm5, %v1258_v8  ;;  %v1242_v9 = vpop.permute.xlu0 %1241 }
 0x159   : > { %1284 = vst.msk [vmem:[#allocation2 + $0x30] sm:$0xff] %vm1277_vm5, %v1242_v9 }
 0x15b   : > { %v1691_v10 = vpop.permute.xlu1 %1690 }
 0x15c   : > { %1725 = vst.msk [vmem:[#allocation2 + $0x70] sm:$0xff] %vm1710_vm6, %v1691_v10  ;;  %v1675_v11 = vpop.permute.xlu0 %1674 }
 0x15d   : > { %1717 = vst.msk [vmem:[#allocation2 + $0x30] sm:$0xff] %vm1710_vm6, %v1675_v11 }
 0x15f   : > { %v1980_v12 = vpop.permute.xlu1 %1979 }
 0x160   : > { %2014 = vst.msk [vmem:[#allocation2 + $0x70] sm:$0xff] %vm1999_vm7, %v1980_v12  ;;  %v1964_v6 = vpop.permute.xlu0 %1963 }
 0x161   : > { %2006 = vst.msk [vmem:[#allocation2 + $0x30] sm:$0xff] %vm1999_vm7, %v1964_v6 }
 0x163   : > { %v2158_v13 = vpop.permute.xlu1 %2157 }
 0x164   : > { %2192 = vst.msk [vmem:[#allocation2 + $0x70] sm:$0xff] %vm2177_vm8, %v2158_v13  ;;  %v2142_v14 = vpop.permute.xlu0 %2141 }
 0x165   : > { %2184 = vst.msk [vmem:[#allocation2 + $0x30] sm:$0xff] %vm2177_vm8, %v2142_v14 }
 0x167   : > { %v2591_v15 = vpop.permute.xlu1 %2590 }
 0x168   : > { %2625 = vst.msk [vmem:[#allocation2 + $0x70] sm:$0xff] %vm2610_vm9, %v2591_v15  ;;  %v2575_v16 = vpop.permute.xlu0 %2574 }
 0x169   : > { %2617 = vst.msk [vmem:[#allocation2 + $0x30] sm:$0xff] %vm2610_vm9, %v2575_v16 }
 0x16b   : > { %v2880_v17 = vpop.permute.xlu1 %2879 }
 0x16c   : > { %2914 = vst.msk [vmem:[#allocation2 + $0x70] sm:$0xff] %vm2899_vm10, %v2880_v17  ;;  %v2864_v18 = vpop.permute.xlu0 %2863 }
 0x16d   : > { %2906 = vst.msk [vmem:[#allocation2 + $0x30] sm:$0xff] %vm2899_vm10, %v2864_v18 }
 0x16f   : > { %v792_v19 = vpop.permute.xlu1 %791 }
 0x170   : > { %825 = vst.msk [vmem:[#allocation2 + $0x78] sm:$0xff] %vm809_vm3, %v792_v19  ;;  %v776_v20 = vpop.permute.xlu0 %775 }
 0x171   : > { %817 = vst.msk [vmem:[#allocation2 + $0x38] sm:$0xff] %vm809_vm3, %v776_v20 }
 0x173   : > { %v2931_v21 = vld [vmem:[#allocation2 + $0x70] sm:$0xff]  ;;  %v1082_v22 = vpop.permute.xlu1 %1081 }
 0x174   : > { %3753 = vmatprep.subr.msk.bf16.mxu0 %vm2933_vm11, %v2931_v21  ;;  %1115 = vst.msk [vmem:[#allocation2 + $0x78] sm:$0xff] %vm1099_vm4, %v1082_v22  ;;  %v2923_v23 = vld [vmem:[#allocation2 + $0x30] sm:$0xff]  ;;  %v1066_v25 = vpop.permute.xlu0 %1065 }
 0x175   : > { %v2956_v24 = vsel %vm2933_vm11, %v2923_v23, 0  ;;  %1107 = vst.msk [vmem:[#allocation2 + $0x38] sm:$0xff] %vm1099_vm4, %v1066_v25 }
 0x176   : > { %3742 = vmatpush3.bf16.xpose.msra.mxu0 %v2956_v24 }
 0x177   : > { %v1260_v26 = vpop.permute.xlu1 %1259 }
 0x178   : > { %1293 = vst.msk [vmem:[#allocation2 + $0x78] sm:$0xff] %vm1277_vm5, %v1260_v26  ;;  %v1244_v27 = vpop.permute.xlu0 %1243 }
 0x179   : > { %1285 = vst.msk [vmem:[#allocation2 + $0x38] sm:$0xff] %vm1277_vm5, %v1244_v27 }
 0x17b   : > { %v1693_v28 = vpop.permute.xlu1 %1692 }
 0x17c   : > { %1726 = vst.msk [vmem:[#allocation2 + $0x78] sm:$0xff] %vm1710_vm6, %v1693_v28  ;;  %v1677_v29 = vpop.permute.xlu0 %1676 }
 0x17d   : > { %1718 = vst.msk [vmem:[#allocation2 + $0x38] sm:$0xff] %vm1710_vm6, %v1677_v29 }
 0x17f   : > { %v1982_v30 = vpop.permute.xlu1 %1981 }
 0x180   : > { %2015 = vst.msk [vmem:[#allocation2 + $0x78] sm:$0xff] %vm1999_vm7, %v1982_v30  ;;  %v1966_v31 = vpop.permute.xlu0 %1965 }
 0x181   : > { %2007 = vst.msk [vmem:[#allocation2 + $0x38] sm:$0xff] %vm1999_vm7, %v1966_v31 }
 0x183   : > { %v2160_v32 = vpop.permute.xlu1 %2159 }
 0x184   : > { %2193 = vst.msk [vmem:[#allocation2 + $0x78] sm:$0xff] %vm2177_vm8, %v2160_v32  ;;  %v2144_v33 = vpop.permute.xlu0 %2143 }
 0x185   : > { %2185 = vst.msk [vmem:[#allocation2 + $0x38] sm:$0xff] %vm2177_vm8, %v2144_v33 }
 0x187   : > { %v2593_v34 = vpop.permute.xlu1 %2592 }
 0x188   : > { %2626 = vst.msk [vmem:[#allocation2 + $0x78] sm:$0xff] %vm2610_vm9, %v2593_v34  ;;  %v2577_v35 = vpop.permute.xlu0 %2576 }
 0x189   : > { %2618 = vst.msk [vmem:[#allocation2 + $0x38] sm:$0xff] %vm2610_vm9, %v2577_v35 }
 0x18b   : > { %v2882_v36 = vpop.permute.xlu1 %2881 }
 0x18c   : > { %2915 = vst.msk [vmem:[#allocation2 + $0x78] sm:$0xff] %vm2899_vm10, %v2882_v36  ;;  %v2866_v37 = vpop.permute.xlu0 %2865 }
 0x18d   : > { %2907 = vst.msk [vmem:[#allocation2 + $0x38] sm:$0xff] %vm2899_vm10, %v2866_v37 }
 0x193   : > { %v2932_v39 = vld [vmem:[#allocation2 + $0x78] sm:$0xff] }
 0x194   : > { %3754 = vmatprep.subr.msk.bf16.mxu0 %vm2933_vm11, %v2932_v39  ;;  %v2924_v40 = vld [vmem:[#allocation2 + $0x38] sm:$0xff] }
 0x195   : > { %v2959_v41 = vsel %vm2933_vm11, %v2924_v40, 0 }
 0x196   : > { %3744 = vmatpush3.bf16.xpose.msra.mxu0 %v2959_v41 }
 0x19d   : > { %3746 = vmatmul.mubr.msk.bf16.vlgmr.msra.gmra.mrb[0].mxu0 %vm2933_vm11, %v4808_v38 }
 0x270   : > { %v3019_v43 = vpop.f32.mrb[0].mxu0 }
 0x271   : > { %v3050_v44 = vmul.f32 %v3019_v43, %v3019_v43  ;;  %v3021_v45 = vpop.f32.mrb[1].mxu0 }
 0x272   : > { %v3727_v46 = vpack.c.bf16 %v3021_v45, %v3019_v43  ;;  %v3043_v47 = vadd.f32 %v3021_v45, %v3019_v43  ;;  %v3051_v38 = vmul.f32 %v3021_v45, %v3021_v45  ;;  %v3023_v48 = vpop.f32.mrb[2].mxu0 }
 0x273   : > { %v3024_v49 = vpop.f32.mrb[3].mxu0 }
 0x274   : > { %3044 = vadd.xlane.f32.xlu0 %v3043_v47  ;;  %v3052_v50 = vadd.f32 %v3051_v38, %v3050_v44  ;;  %3034 = vst [vmem:[%s215_s29] sm:$0xff] %v3727_v46 }
 0x276   : > { %3053 = vadd.xlane.f32.xlu1 %v3052_v50 }
 0x277   : > { %4073 = shalt.err (!%p4070_p5)
}
 0x278   : > { %s4074_s18 = scalar_lea.hbm %s4899_s22, 128  ;;  %s4078_s9 = scalar_lea.hbm %s4948_s2, 256 }
 0x279   : > { %p4075_p6 = scmp.ne.s32.totalorder %s4899_s22, %s4074_s18  ;;  %p4079_p10 = scmp.lt.u32.totalorder %s4899_s22, %s4948_s2 }
 0x27a   : > { %p4080_p11 = scmp.lt.u32.totalorder %s4078_s9, %s4074_s18  ;;  %p4082_p13 = scmp.lt.u32.totalorder %s4074_s18, %s4899_s22 }
 0x27b   : > { %p4076_p7 = pnand %p4075_p6, %p4215_p4 }
 0x27c   : > { %p4081_p12 = por %p4080_p11, %p4079_p10 }
 0x27d   : > { %p4077_p9 = pneg %p4076_p7 }
 0x27e   : > { %p4083_p0 = por %p4082_p13, %p4081_p12 }
 0x280   : > { %p4084_p1 = pnand %p4083_p0, %p4077_p9 }
 0x282   : > { %4087 = shalt.err (!%p4084_p1)
}
 0x283   : > { %3756 = dma.vmem_to_hbm [thread:$0]  (%p4215_p4), %s3083_s13, 128, %s4899_s22, %s3058_s24   ;;  %v3042_v51 = vld [vmem:[%s4883_s6] sm:$0xff] }
 0x284   : > { %v3049_v53 = vld [vmem:[%s4891_s11] sm:$0xff] }
 0x301   : > { %v3045_v52 = vpop.xlane.xlu0 %3044 }
 0x302   : > { %v3046_v54 = vadd.f32 %v3045_v52, %v3042_v51 }
 0x303   : > { %v3054_v55 = vpop.xlane.xlu1 %3053 }
 0x304   : > { %3048 = vst.msk [vmem:[%s4883_s6] sm:$0xff] %vm3039_vm12, %v3046_v54  ;;  %v3055_v56 = vadd.f32 %v3054_v55, %v3049_v53 }
 0x306   : > { %3056 = vst.msk [vmem:[%s4891_s11] sm:$0xff] %vm3039_vm12, %v3055_v56 }
 0x307 PF: > { %p3762_p2 = scmp.ge.s32.totalorder %s4138_s20, 2  ;;  %s3100_s25 = sand.u32 1, %s4118_s15  }
 0x308   : > { %s3101_s14 = scalar_lea.sflag [#allocation4], %s3100_s25 }
 0x309   : > { %p3759_p3 = pnand %p3762_p2, %p4222_p8 }
 0x30b   : > { %4113 = dma.done.wait (!%p3759_p3), %s3101_s14, 128  }
 0x30c   : > { %4115 = vsyncadd (!%p3759_p3), %s3101_s14, 4294967168  ;;  %s18_s20 = sadd.s32 1, %s4138_s20   ;;  %s4953_s15 = smov %s4122_s16 }
 0x30d   : > { %p15_p4 = scmp.ge.s32.totalorder %s18_s20, 4   ;;  %s4954_s16 = smov %s4126_s17 }
 0x30e   : > { %s4955_s17 = smov %s4228_s28  ;;  %s4956_s18 = smov %s4134_s19 }
 0x30f   : > { %s4957_s19 = smov %s4959_s23  ;;  %17 = sbr.rel (!%p15_p4) target bundleno = 4 (0x4), region = 93 }
 0x316   :  { %3120 = vsyncpa [#allocation4], 1 }
 0x317   :  { %3122 = vsyncpa [#allocation4 + $0x1], 1 }

</bundles_post_ra>
